<compile_context>
chip_gen: v7x
topology: tpu7x:2x2x1
jax: 0.10.0
libtpu: 0.0.40
codegen_flags: <defaults>
</compile_context>

<pallas_src>
import functools

import numpy as np
import jax
import jax.numpy as jnp
from jax import lax
from jax.experimental import pallas as pl
from jax.experimental.pallas import tpu as pltpu


NUM_CLASSES = 2
NCP = 128      # padded class dim (lane-dense FC matmul + store; sliced outside)
CIP = 8        # input channels padded 3 -> 8 (sublane-aligned tap stacking)


# ---------------------------------------------------------------------------
# Static lane-layout geometry for one (CIP, B*H*W) slab
# ---------------------------------------------------------------------------

def _geometry(H, W, B):
    HW = H * W
    OH1, OW1 = H - 2, W - 2              # conv1 output (valid)
    P1h, P1w = OH1 // 2, OW1 // 2        # after maxpool1 (floor)
    OH2, OW2 = P1h - 2, P1w - 2          # conv2 output
    P2h, P2w = OH2 // 2, OW2 // 2        # after maxpool2 (= adaptive-avg src)
    assert OH2 >= 1 and OW2 >= 1 and P2h >= 1 and P2w >= 1

    L1 = (OH1 - 1) * W + OW1             # conv1 anchor span per image
    LT1 = (B - 1) * HW + L1              # conv1 slab length (lanes)
    LT1m = LT1 - (W + 1)                 # after pool1 4-way shifted max
    # conv2 lives on the stride-2 pooled grid: output (ph,pw) is anchored at
    # lane 2*ph*W + 2*pw; tap (di,dj) reads offset 2*(di*W + dj).
    L2 = 2 * (OH2 - 1) * W + 2 * (OW2 - 1) + 1
    LT2 = (B - 1) * HW + L2
    LT2m = LT2 - (2 * W + 2)             # after pool2 4-way shifted max

    # every shifted slice must stay inside its source slab
    assert (2 * W + 2) + LT1 <= B * HW                       # conv1 taps
    assert (4 * W + 4) + L2 <= L1 - (W + 1)                  # conv2 taps
    assert 4 * (P2h - 1) * W + 4 * (P2w - 1) <= L2 - (2 * W + 2) - 1  # GAP rows
    return dict(HW=HW, P2h=P2h, P2w=P2w, LT1=LT1, LT1m=LT1m, LT2=LT2, LT2m=LT2m)


# ---------------------------------------------------------------------------
# Fused kernel
# ---------------------------------------------------------------------------

def _make_cnn_kernel(W, g):
    LT1, LT1m, LT2, LT2m = g["LT1"], g["LT1m"], g["LT2"], g["LT2m"]

    def kernel(x_ref, w1_ref, b1_ref, w2_ref, b2_ref, wfc_ref, bfc_ref,
               selg_ref, o_ref):
        x = x_ref[0]                                          # (CIP, B*HW)

        # ---- conv1 + bias + ReLU: 9 shifted taps stacked on sublanes,
        #      one K=9*CIP MXU matmul ----
        xs1 = jnp.concatenate(
            [x[:, di * W + dj: di * W + dj + LT1]
             for di in range(3) for dj in range(3)], axis=0)  # (9*CIP, LT1)
        a1 = jnp.dot(w1_ref[...], xs1, preferred_element_type=jnp.float32)
        a1 = jnp.maximum(a1 + b1_ref[...], 0.0)               # (C1, LT1)

        # ---- maxpool1 (2x2, stride 2): 4-way shifted max (VPU);
        #      result stays in the strided lane layout ----
        m1 = jnp.maximum(
            jnp.maximum(a1[:, 0:LT1m], a1[:, 1:1 + LT1m]),
            jnp.maximum(a1[:, W:W + LT1m], a1[:, W + 1:W + 1 + LT1m]))

        # ---- conv2 + bias + ReLU on the stride-2 grid: tap offsets
        #      2*(di*W + dj), one K=9*C1 MXU matmul ----
        xs2 = jnp.concatenate(
            [m1[:, 2 * (di * W + dj): 2 * (di * W + dj) + LT2]
             for di in range(3) for dj in range(3)], axis=0)  # (9*C1, LT2)
        a2 = jnp.dot(w2_ref[...], xs2, preferred_element_type=jnp.float32)
        a2 = jnp.maximum(a2 + b2_ref[...], 0.0)               # (C2, LT2)

        # ---- maxpool2 on the stride-2 grid: deltas {0, 2, 2W, 2W+2} ----
        m2 = jnp.maximum(
            jnp.maximum(a2[:, 0:LT2m], a2[:, 2:2 + LT2m]),
            jnp.maximum(a2[:, 2 * W:2 * W + LT2m],
                        a2[:, 2 * W + 2:2 * W + 2 + LT2m]))

        # ---- global average pool: pre-scaled 0/1 selection matmul picks the
        #      P2h*P2w valid pool2 lanes of each image (no 1-lane VPU slices) ----
        gap = jnp.dot(m2, selg_ref[...],
                      preferred_element_type=jnp.float32)     # (C2, B)

        # ---- linear head, lane-dense (B, 128) output block ----
        o_ref[0] = lax.dot_general(
            gap, wfc_ref[...], (((0,), (0,)), ((), ())),       # gap.T @ wfc
            preferred_element_type=jnp.float32) + bfc_ref[...]

    return kernel


def _make_gap_select(B, W, HW, LT2m, P2h, P2w):
    """(LT2m, B) 0/1 matrix (pre-scaled by 1/(P2h*P2w)) selecting each image's
    valid pool2 lanes (anchors 4*qr*W + 4*qc) -> per-image GAP via one matmul."""
    sel = np.zeros((LT2m, B), np.float32)
    inv = 1.0 / float(P2h * P2w)
    for b in range(B):
        for qr in range(P2h):
            for qc in range(P2w):
                sel[b * HW + 4 * qr * W + 4 * qc, b] = inv
    return jnp.asarray(sel)


# ---------------------------------------------------------------------------
# Forward pass
# ---------------------------------------------------------------------------

@functools.partial(jax.jit, static_argnames=("batch_per_step",))
def cnn_forward(x_nchw, params, batch_per_step=8):
    N, C_in, H, W = x_nchw.shape
    assert C_in <= CIP
    w1, b1 = params["w1"], params["b1"]          # (16,3,3,3), (16,)
    w2, b2 = params["w2"], params["b2"]          # (32,16,3,3), (32,)
    w_fc, b_fc = params["w_fc"], params["b_fc"]  # (2,32), (2,)
    C1, C2 = w1.shape[0], w2.shape[0]

    # Images per grid step.  On v7x pick batch_per_step so that steps >= 2
    # (keeps both TensorCores busy via the "parallel" grid axis).
    B = max(1, min(batch_per_step, N))
    steps = pl.cdiv(N, B)
    N_pad = steps * B
    g = _geometry(H, W, B)
    HW = g["HW"]

    kernel = _make_cnn_kernel(W, g)

    # ---- one-time layout glue (tiny, static shapes) ----
    x = x_nchw.astype(jnp.float32)
    x = jnp.pad(x, ((0, N_pad - N), (0, CIP - C_in), (0, 0), (0, 0)))
    # (steps, CIP, B*HW): the B images of each step packed along the lane axis
    x_packed = (x.reshape(steps, B, CIP, HW)
                  .transpose(0, 2, 1, 3)
                  .reshape(steps, CIP, B * HW))

    # conv weights -> (OC, KH*KW*ICpad), matching the tap-stacking row order
    w1f = jnp.pad(jnp.transpose(w1.astype(jnp.float32), (0, 2, 3, 1)),
                  ((0, 0), (0, 0), (0, 0), (0, CIP - C_in))).reshape(C1, 9 * CIP)
    w2f = jnp.transpose(w2.astype(jnp.float32), (0, 2, 3, 1)).reshape(C2, 9 * C1)
    b1c = b1.reshape(C1, 1).astype(jnp.float32)
    b2c = b2.reshape(C2, 1).astype(jnp.float32)
    wfc_t = jnp.zeros((C2, NCP), jnp.float32).at[:, :NUM_CLASSES].set(
        w_fc.astype(jnp.float32).T)
    bfc_r = jnp.zeros((1, NCP), jnp.float32).at[0, :NUM_CLASSES].set(
        b_fc.astype(jnp.float32))
    selg = _make_gap_select(B, W, HW, g["LT2m"], g["P2h"], g["P2w"])

    def full(a):   # whole-array block, constant index map -> VMEM-resident
        return pl.BlockSpec(a.shape, lambda n, _nd=a.ndim: (0,) * _nd)

    out = pl.pallas_call(
        kernel,
        grid=(steps,),
        in_specs=[
            pl.BlockSpec((1, CIP, B * HW), lambda n: (n, 0, 0)),  # per-step slab
            full(w1f), full(b1c), full(w2f), full(b2c),
            full(wfc_t), full(bfc_r), full(selg),
        ],
        out_specs=pl.BlockSpec((1, B, NCP), lambda n: (n, 0, 0)),
        out_shape=jax.ShapeDtypeStruct((steps, B, NCP), jnp.float32),
        compiler_params=pltpu.CompilerParams(
            dimension_semantics=("parallel",)),
    )(x_packed, w1f, b1c, w2f, b2c, wfc_t, bfc_r, selg)

    return out.reshape(N_pad, NCP)[:N, :NUM_CLASSES]          # (N, 2)


# ---------------------------------------------------------------------------
# Params + pure-JAX reference (sanity check)
# ---------------------------------------------------------------------------

def init_params(key):
    ks = jax.random.split(key, 6)

    def uniform(k, shape, fan_in):
        bound = 1.0 / jnp.sqrt(fan_in)
        return jax.random.uniform(k, shape, jnp.float32, -bound, bound)

    return {
        "w1": uniform(ks[0], (16, 3, 3, 3), 3 * 3 * 3),
        "b1": uniform(ks[1], (16,), 3 * 3 * 3),
        "w2": uniform(ks[2], (32, 16, 3, 3), 16 * 3 * 3),
        "b2": uniform(ks[3], (32,), 16 * 3 * 3),
        "w_fc": uniform(ks[4], (2, 32), 32),
        "b_fc": uniform(ks[5], (2,), 32),
    }


def cnn_reference(x_nchw, params):
    dn = ("NCHW", "OIHW", "NCHW")
    x = x_nchw.astype(jnp.float32)
    y = lax.conv_general_dilated(x, params["w1"].astype(jnp.float32), (1, 1),
                                 "VALID", dimension_numbers=dn,
                                 precision=lax.Precision.HIGHEST)
    y = jax.nn.relu(y + params["b1"].reshape(1, -1, 1, 1))
    y = lax.reduce_window(y, -jnp.inf, lax.max, (1, 1, 2, 2), (1, 1, 2, 2), "VALID")
    y = lax.conv_general_dilated(y, params["w2"].astype(jnp.float32), (1, 1),
                                 "VALID", dimension_numbers=dn,
                                 precision=lax.Precision.HIGHEST)
    y = jax.nn.relu(y + params["b2"].reshape(1, -1, 1, 1))
    y = lax.reduce_window(y, -jnp.inf, lax.max, (1, 1, 2, 2), (1, 1, 2, 2), "VALID")
    pooled = jnp.mean(y, axis=(2, 3))
    return pooled @ params["w_fc"].T + params["b_fc"]


if __name__ == "__main__":
    key = jax.random.PRNGKey(0)
    k_x, k_p = jax.random.split(key)
    x = jax.random.normal(k_x, (4, 3, 16, 16), jnp.float32)   # NCHW input
    params = init_params(k_p)

    ref = cnn_reference(x, params)

    # All 4 images lane-packed into a single grid step.
    out = cnn_forward(x, params)
    jax.block_until_ready(out)
    assert out.shape == (4, 2) and out.dtype == jnp.float32
    assert jnp.allclose(out, ref, atol=1e-3, rtol=1e-3), (out, ref)

    # 2 grid steps of 3 images each (exercises batch padding + multi-step grid).
    out2 = cnn_forward(x, params, batch_per_step=3)
    jax.block_until_ready(out2)
    assert out2.shape == (4, 2)
    assert jnp.allclose(out2, ref, atol=1e-3, rtol=1e-3), (out2, ref)

    print("KERNEL_OK")
</pallas_src>

<mosaic_0001>
module attributes {stable_mosaic.version = 11 : i64} {
  func.func @kernel(%arg0: i32, %arg1: memref<1x8x1024xf32, #tpu.memory_space<vmem>>, %arg2: memref<16x72xf32, #tpu.memory_space<vmem>>, %arg3: memref<16x1xf32, #tpu.memory_space<vmem>>, %arg4: memref<32x144xf32, #tpu.memory_space<vmem>>, %arg5: memref<32x1xf32, #tpu.memory_space<vmem>>, %arg6: memref<32x128xf32, #tpu.memory_space<vmem>>, %arg7: memref<1x128xf32, #tpu.memory_space<vmem>>, %arg8: memref<871x4xf32, #tpu.memory_space<vmem>>, %arg9: memref<1x4x128xf32, #tpu.memory_space<vmem>>) attributes {dimension_semantics = [#tpu.dimension_semantics<parallel>], iteration_bounds = array<i64: 1>, scalar_prefetch = 0 : i64, scratch_operands = 0 : i64, tpu.core_type = #tpu.core_type<tc>, window_params = [{transform_indices = @transform_0, window_bounds = array<i64: 1, 8, 1024>}, {pipeline_mode = #tpu.pipeline_mode<synchronous>, transform_indices = @transform_1, window_bounds = array<i64: 16, 72>}, {pipeline_mode = #tpu.pipeline_mode<synchronous>, transform_indices = @transform_2, window_bounds = array<i64: 16, 1>}, {pipeline_mode = #tpu.pipeline_mode<synchronous>, transform_indices = @transform_3, window_bounds = array<i64: 32, 144>}, {pipeline_mode = #tpu.pipeline_mode<synchronous>, transform_indices = @transform_4, window_bounds = array<i64: 32, 1>}, {pipeline_mode = #tpu.pipeline_mode<synchronous>, transform_indices = @transform_5, window_bounds = array<i64: 32, 128>}, {pipeline_mode = #tpu.pipeline_mode<synchronous>, transform_indices = @transform_6, window_bounds = array<i64: 1, 128>}, {pipeline_mode = #tpu.pipeline_mode<synchronous>, transform_indices = @transform_7, window_bounds = array<i64: 871, 4>}, {transform_indices = @transform_8, window_bounds = array<i64: 1, 4, 128>}]} {
    %c0 = arith.constant 0 : index
    %c0_0 = arith.constant 0 : index
    %c0_1 = arith.constant 0 : index
    %0 = vector.load %arg1[%c0, %c0_0, %c0_1] : memref<1x8x1024xf32, #tpu.memory_space<vmem>>, vector<1x8x1024xf32>
    %1 = vector.shape_cast %0 : vector<1x8x1024xf32> to vector<8x1024xf32>
    %2 = vector.extract_strided_slice %1 {offsets = [0, 0], sizes = [8, 990], strides = [1, 1]} : vector<8x1024xf32> to vector<8x990xf32>
    %3 = vector.extract_strided_slice %1 {offsets = [0, 1], sizes = [8, 990], strides = [1, 1]} : vector<8x1024xf32> to vector<8x990xf32>
    %4 = vector.extract_strided_slice %1 {offsets = [0, 2], sizes = [8, 990], strides = [1, 1]} : vector<8x1024xf32> to vector<8x990xf32>
    %5 = vector.extract_strided_slice %1 {offsets = [0, 16], sizes = [8, 990], strides = [1, 1]} : vector<8x1024xf32> to vector<8x990xf32>
    %6 = vector.extract_strided_slice %1 {offsets = [0, 17], sizes = [8, 990], strides = [1, 1]} : vector<8x1024xf32> to vector<8x990xf32>
    %7 = vector.extract_strided_slice %1 {offsets = [0, 18], sizes = [8, 990], strides = [1, 1]} : vector<8x1024xf32> to vector<8x990xf32>
    %8 = vector.extract_strided_slice %1 {offsets = [0, 32], sizes = [8, 990], strides = [1, 1]} : vector<8x1024xf32> to vector<8x990xf32>
    %9 = vector.extract_strided_slice %1 {offsets = [0, 33], sizes = [8, 990], strides = [1, 1]} : vector<8x1024xf32> to vector<8x990xf32>
    %10 = vector.extract_strided_slice %1 {offsets = [0, 34], sizes = [8, 990], strides = [1, 1]} : vector<8x1024xf32> to vector<8x990xf32>
    %11 = tpu.concatenate %2, %3, %4, %5, %6, %7, %8, %9, %10 in 0 : vector<8x990xf32>, vector<8x990xf32>, vector<8x990xf32>, vector<8x990xf32>, vector<8x990xf32>, vector<8x990xf32>, vector<8x990xf32>, vector<8x990xf32>, vector<8x990xf32> -> vector<72x990xf32>
    %c0_2 = arith.constant 0 : index
    %c0_3 = arith.constant 0 : index
    %12 = vector.load %arg2[%c0_2, %c0_3] : memref<16x72xf32, #tpu.memory_space<vmem>>, vector<16x72xf32>
    %cst = arith.constant dense<0.000000e+00> : vector<16x990xf32>
    %13 = tpu.matmul %12, %11, %cst {dimension_numbers = #tpu.dot_dimension_numbers<[1], [0], [0], [1], [0, 0, 1, 1], [], []>} : vector<16x72xf32>, vector<72x990xf32>, vector<16x990xf32> -> vector<16x990xf32>
    %c0_4 = arith.constant 0 : index
    %c0_5 = arith.constant 0 : index
    %14 = vector.load %arg3[%c0_4, %c0_5] : memref<16x1xf32, #tpu.memory_space<vmem>>, vector<16x1xf32>
    %15 = vector.broadcast %14 : vector<16x1xf32> to vector<16x990xf32>
    %16 = arith.addf %13, %15 : vector<16x990xf32>
    %cst_6 = arith.constant 0.000000e+00 : f32
    %17 = vector.broadcast %cst_6 : f32 to vector<16x990xf32>
    %18 = arith.maximumf %16, %17 : vector<16x990xf32>
    %19 = vector.extract_strided_slice %18 {offsets = [0, 0], sizes = [16, 973], strides = [1, 1]} : vector<16x990xf32> to vector<16x973xf32>
    %20 = vector.extract_strided_slice %18 {offsets = [0, 1], sizes = [16, 973], strides = [1, 1]} : vector<16x990xf32> to vector<16x973xf32>
    %21 = arith.maximumf %19, %20 : vector<16x973xf32>
    %22 = vector.extract_strided_slice %18 {offsets = [0, 16], sizes = [16, 973], strides = [1, 1]} : vector<16x990xf32> to vector<16x973xf32>
    %23 = vector.extract_strided_slice %18 {offsets = [0, 17], sizes = [16, 973], strides = [1, 1]} : vector<16x990xf32> to vector<16x973xf32>
    %24 = arith.maximumf %22, %23 : vector<16x973xf32>
    %25 = arith.maximumf %21, %24 : vector<16x973xf32>
    %26 = vector.extract_strided_slice %25 {offsets = [0, 0], sizes = [16, 905], strides = [1, 1]} : vector<16x973xf32> to vector<16x905xf32>
    %27 = vector.extract_strided_slice %25 {offsets = [0, 2], sizes = [16, 905], strides = [1, 1]} : vector<16x973xf32> to vector<16x905xf32>
    %28 = vector.extract_strided_slice %25 {offsets = [0, 4], sizes = [16, 905], strides = [1, 1]} : vector<16x973xf32> to vector<16x905xf32>
    %29 = vector.extract_strided_slice %25 {offsets = [0, 32], sizes = [16, 905], strides = [1, 1]} : vector<16x973xf32> to vector<16x905xf32>
    %30 = vector.extract_strided_slice %25 {offsets = [0, 34], sizes = [16, 905], strides = [1, 1]} : vector<16x973xf32> to vector<16x905xf32>
    %31 = vector.extract_strided_slice %25 {offsets = [0, 36], sizes = [16, 905], strides = [1, 1]} : vector<16x973xf32> to vector<16x905xf32>
    %32 = vector.extract_strided_slice %25 {offsets = [0, 64], sizes = [16, 905], strides = [1, 1]} : vector<16x973xf32> to vector<16x905xf32>
    %33 = vector.extract_strided_slice %25 {offsets = [0, 66], sizes = [16, 905], strides = [1, 1]} : vector<16x973xf32> to vector<16x905xf32>
    %34 = vector.extract_strided_slice %25 {offsets = [0, 68], sizes = [16, 905], strides = [1, 1]} : vector<16x973xf32> to vector<16x905xf32>
    %35 = tpu.concatenate %26, %27, %28, %29, %30, %31, %32, %33, %34 in 0 : vector<16x905xf32>, vector<16x905xf32>, vector<16x905xf32>, vector<16x905xf32>, vector<16x905xf32>, vector<16x905xf32>, vector<16x905xf32>, vector<16x905xf32>, vector<16x905xf32> -> vector<144x905xf32>
    %c0_7 = arith.constant 0 : index
    %c0_8 = arith.constant 0 : index
    %36 = vector.load %arg4[%c0_7, %c0_8] : memref<32x144xf32, #tpu.memory_space<vmem>>, vector<32x144xf32>
    %cst_9 = arith.constant dense<0.000000e+00> : vector<32x905xf32>
    %37 = tpu.matmul %36, %35, %cst_9 {dimension_numbers = #tpu.dot_dimension_numbers<[1], [0], [0], [1], [0, 0, 1, 1], [], []>} : vector<32x144xf32>, vector<144x905xf32>, vector<32x905xf32> -> vector<32x905xf32>
    %c0_10 = arith.constant 0 : index
    %c0_11 = arith.constant 0 : index
    %38 = vector.load %arg5[%c0_10, %c0_11] : memref<32x1xf32, #tpu.memory_space<vmem>>, vector<32x1xf32>
    %39 = vector.broadcast %38 : vector<32x1xf32> to vector<32x905xf32>
    %40 = arith.addf %37, %39 : vector<32x905xf32>
    %cst_12 = arith.constant 0.000000e+00 : f32
    %41 = vector.broadcast %cst_12 : f32 to vector<32x905xf32>
    %42 = arith.maximumf %40, %41 : vector<32x905xf32>
    %43 = vector.extract_strided_slice %42 {offsets = [0, 0], sizes = [32, 871], strides = [1, 1]} : vector<32x905xf32> to vector<32x871xf32>
    %44 = vector.extract_strided_slice %42 {offsets = [0, 2], sizes = [32, 871], strides = [1, 1]} : vector<32x905xf32> to vector<32x871xf32>
    %45 = arith.maximumf %43, %44 : vector<32x871xf32>
    %46 = vector.extract_strided_slice %42 {offsets = [0, 32], sizes = [32, 871], strides = [1, 1]} : vector<32x905xf32> to vector<32x871xf32>
    %47 = vector.extract_strided_slice %42 {offsets = [0, 34], sizes = [32, 871], strides = [1, 1]} : vector<32x905xf32> to vector<32x871xf32>
    %48 = arith.maximumf %46, %47 : vector<32x871xf32>
    %49 = arith.maximumf %45, %48 : vector<32x871xf32>
    %c0_13 = arith.constant 0 : index
    %c0_14 = arith.constant 0 : index
    %50 = vector.load %arg8[%c0_13, %c0_14] : memref<871x4xf32, #tpu.memory_space<vmem>>, vector<871x4xf32>
    %cst_15 = arith.constant dense<0.000000e+00> : vector<32x4xf32>
    %51 = tpu.matmul %49, %50, %cst_15 {dimension_numbers = #tpu.dot_dimension_numbers<[1], [0], [0], [1], [0, 0, 1, 1], [], []>} : vector<32x871xf32>, vector<871x4xf32>, vector<32x4xf32> -> vector<32x4xf32>
    %c0_16 = arith.constant 0 : index
    %c0_17 = arith.constant 0 : index
    %52 = vector.load %arg6[%c0_16, %c0_17] : memref<32x128xf32, #tpu.memory_space<vmem>>, vector<32x128xf32>
    %cst_18 = arith.constant dense<0.000000e+00> : vector<4x128xf32>
    %53 = tpu.matmul %51, %52, %cst_18 {dimension_numbers = #tpu.dot_dimension_numbers<[0], [0], [1], [1], [0, 1, 1, 1], [], []>} : vector<32x4xf32>, vector<32x128xf32>, vector<4x128xf32> -> vector<4x128xf32>
    %c0_19 = arith.constant 0 : index
    %c0_20 = arith.constant 0 : index
    %54 = vector.load %arg7[%c0_19, %c0_20] : memref<1x128xf32, #tpu.memory_space<vmem>>, vector<1x128xf32>
    %55 = vector.broadcast %54 : vector<1x128xf32> to vector<4x128xf32>
    %56 = arith.addf %53, %55 : vector<4x128xf32>
    %c0_21 = arith.constant 0 : index
    %c0_22 = arith.constant 0 : index
    %c0_23 = arith.constant 0 : index
    %57 = vector.load %arg9[%c0_21, %c0_22, %c0_23] : memref<1x4x128xf32, #tpu.memory_space<vmem>>, vector<1x4x128xf32>
    %58 = vector.shape_cast %57 : vector<1x4x128xf32> to vector<4x128xf32>
    %59 = vector.shape_cast %56 : vector<4x128xf32> to vector<1x4x128xf32>
    tpu.vector_store %arg9[%c0_21, %c0_22, %c0_23], %59 {strides = array<i32>} : memref<1x4x128xf32, #tpu.memory_space<vmem>>, vector<1x4x128xf32>,
    return
  }
  func.func @transform_0(%arg0: i32) -> (i32, i32, i32) {
    %c0_i32 = arith.constant 0 : i32
    %c0_i32_0 = arith.constant 0 : i32
    %c0_i32_1 = arith.constant 0 : i32
    return %arg0, %c0_i32, %c0_i32_0 : i32, i32, i32
  }
  func.func @transform_1(%arg0: i32) -> (i32, i32) {
    %c0_i32 = arith.constant 0 : i32
    %c0_i32_0 = arith.constant 0 : i32
    %c0_i32_1 = arith.constant 0 : i32
    return %c0_i32, %c0_i32_0 : i32, i32
  }
  func.func @transform_2(%arg0: i32) -> (i32, i32) {
    %c0_i32 = arith.constant 0 : i32
    %c0_i32_0 = arith.constant 0 : i32
    %c0_i32_1 = arith.constant 0 : i32
    return %c0_i32, %c0_i32_0 : i32, i32
  }
  func.func @transform_3(%arg0: i32) -> (i32, i32) {
    %c0_i32 = arith.constant 0 : i32
    %c0_i32_0 = arith.constant 0 : i32
    %c0_i32_1 = arith.constant 0 : i32
    return %c0_i32, %c0_i32_0 : i32, i32
  }
  func.func @transform_4(%arg0: i32) -> (i32, i32) {
    %c0_i32 = arith.constant 0 : i32
    %c0_i32_0 = arith.constant 0 : i32
    %c0_i32_1 = arith.constant 0 : i32
    return %c0_i32, %c0_i32_0 : i32, i32
  }
  func.func @transform_5(%arg0: i32) -> (i32, i32) {
    %c0_i32 = arith.constant 0 : i32
    %c0_i32_0 = arith.constant 0 : i32
    %c0_i32_1 = arith.constant 0 : i32
    return %c0_i32, %c0_i32_0 : i32, i32
  }
  func.func @transform_6(%arg0: i32) -> (i32, i32) {
    %c0_i32 = arith.constant 0 : i32
    %c0_i32_0 = arith.constant 0 : i32
    %c0_i32_1 = arith.constant 0 : i32
    return %c0_i32, %c0_i32_0 : i32, i32
  }
  func.func @transform_7(%arg0: i32) -> (i32, i32) {
    %c0_i32 = arith.constant 0 : i32
    %c0_i32_0 = arith.constant 0 : i32
    %c0_i32_1 = arith.constant 0 : i32
    return %c0_i32, %c0_i32_0 : i32, i32
  }
  func.func @transform_8(%arg0: i32) -> (i32, i32, i32) {
    %c0_i32 = arith.constant 0 : i32
    %c0_i32_0 = arith.constant 0 : i32
    %c0_i32_1 = arith.constant 0 : i32
    return %arg0, %c0_i32, %c0_i32_0 : i32, i32, i32
  }
}

</mosaic_0001>

<bundles_post_ra>
// kernel: cnn_forward.1
= control target key start
LH: loop header
LB: loop body
LE: loop exit
PB: predicated region body
PF: predicated region fallthrough
CT: control target
= control target key end

     0   :  { %s3954_s13 = smov 126   ;;  %s3955_s14 = smov 127   ;;  %v6216_v10 = vmov 0.0   ;;  %v3963_v12 = vmov 0   ;;  %vm61_vm0 = vcmask 1039360   ;;  %vm93_vm1 = vcmask 1031168   ;;  %s6207_s0 = inlined_call_operand.vmem [shape: f32[1,8,1024], index: 0, kind: input, shape index: {}]   ;;  %s6208_s2 = inlined_call_operand.vmem [shape: f32[16,1], index: 2, kind: input, shape index: {}]   ;;  %s6209_s1 = inlined_call_operand.vmem [shape: f32[16,72], index: 1, kind: input, shape index: {}]   ;;  %s6210_s3 = inlined_call_operand.vmem [shape: f32[32,144], index: 3, kind: input, shape index: {}]   ;;  %s6211_s4 = inlined_call_operand.vmem [shape: f32[32,1], index: 4, kind: input, shape index: {}]   ;;  %s6212_s7 = inlined_call_operand.vmem [shape: f32[871,4], index: 7, kind: input, shape index: {}]   ;;  %s6213_s5 = inlined_call_operand.vmem [shape: f32[32,128], index: 5, kind: input, shape index: {}]   ;;  %s6214_s6 = inlined_call_operand.vmem [shape: f32[1,128], index: 6, kind: input, shape index: {}]   ;;  %s6215_s8 = inlined_call_operand.vmem [shape: f32[1,4,128], index: 8, kind: output, shape index: {}]  }
   0x1   :  { %v4019_v0 = vld [vmem:[%s6207_s0 + $0x8] sm:$0xff]  ;;  %v4024_v1 = vld [vmem:[%s6207_s0 + $0x10] sm:$0xff]  ;;  %v4029_v2 = vld [vmem:[%s6207_s0] sm:$0xff]  ;;  %s3956_s15 = smov 112   ;;  %s3957_s16 = smov 110   ;;  %386 = vmatprep.mubr.f32.mxu0 %v6216_v10  ;;  %463 = vmatprep.mubr.f32.mxu1 %v6216_v10  ;;  %vm125_vm2 = vcmask 916480  }
   0x2   :  { %v3337_v3 = vpack.i.bf16 %v4024_v1, %v4019_v0  ;;  %v4036_v4 = vld [vmem:[%s6207_s0 + $0x18] sm:$0xff]  ;;  %s3958_s17 = smov 111   ;;  %s3959_s18 = smov 95   ;;  %v4055_v6 = vld [vmem:[%s6207_s0 + $0x20] sm:$0xff]  ;;  %v4060_v7 = vld [vmem:[%s6207_s0 + $0x28] sm:$0xff]  ;;  %3433 = vset.pattern.permute.xlu0 %v3963_v12  ;;  %3432 = vset.pattern.permute.xlu1 %v3963_v12  ;;  %vm157_vm3 = vcmask 908288  }
   0x3   :  { %v3332_v5 = vpack.i.bf16 %v4036_v4, %v4029_v2  ;;  %s3960_s19 = smov 96   ;;  %v3397_v8 = vpack.i.bf16 %v4060_v7, %v4055_v6  ;;  %v4069_v9 = vld [vmem:[%s6207_s0 + $0x30] sm:$0xff]  ;;  %s3962_s26 = smov 94   ;;  %v4105_v11 = vld [vmem:[%s6207_s0 + $0x38] sm:$0xff]  ;;  %v303_v13 = vld [vmem:[%s6208_s2] sm:$0xff]  ;;  %vm189_vm4 = vcmask 900096  }
   0x4   :  { %3338 = vrot.lane.b32.xlu1 %v3337_v3, %s3954_s13  ;;  %3328 = vrot.lane.b32.xlu0 %v3337_v3, %s3955_s14  ;;  %v304_v14 = vld [vmem:[%s6208_s2 + $0x8] sm:$0xff]  ;;  %vm221_vm5 = vcmask 785408   ;;  %vm253_vm6 = vcmask 777216   ;;  %vm285_vm7 = vcmask 769024   ;;  %vm315_vm8 = vcmask 588800  }
   0x5   :  { %vm1383_vm9 = vcmask 130048   ;;  %vm944_vm10 = vcmask 1014784   ;;  %vm1194_vm11 = vcmask 523264   ;;  %vm1131_vm12 = vcmask 752640  }
   0x6   :  { %vm1320_vm13 = vcmask 490496   ;;  %vm1257_vm14 = vcmask 506880   ;;  %vm2282_vm15 = vcmask 1046528  }
   0x8   :  { %3343 = vrot.lane.b32.xlu1 %v3337_v3, %s3956_s15  ;;  %3333 = vrot.lane.b32.xlu0 %v3332_v5, %s3955_s14 }
   0xc   :  { %3353 = vrot.lane.b32.xlu1 %v3332_v5, %s3956_s15  ;;  %3348 = vrot.lane.b32.xlu0 %v3332_v5, %s3954_s13 }
  0x10   :  { %3363 = vrot.lane.b32.xlu1 %v3337_v3, %s3957_s16  ;;  %3358 = vrot.lane.b32.xlu0 %v3337_v3, %s3958_s17 }
  0x14   :  { %3373 = vrot.lane.b32.xlu1 %v3332_v5, %s3957_s16  ;;  %3368 = vrot.lane.b32.xlu0 %v3332_v5, %s3958_s17 }
  0x18   :  { %3383 = vrot.lane.b32.xlu1 %v3337_v3, %s3959_s18  ;;  %3378 = vrot.lane.b32.xlu0 %v3337_v3, %s3960_s19 }
  0x1c   :  { %3393 = vrot.lane.b32.xlu1 %v3332_v5, %s3959_s18  ;;  %3388 = vrot.lane.b32.xlu0 %v3332_v5, %s3960_s19 }
  0x20   :  { %57 = vrot.lane.b32.xlu1 %v4069_v9, %s3955_s14  ;;  %3398 = vrot.lane.b32.xlu0 %v3397_v8, %s3955_s14 }
  0x24   :  { %273 = vrot.lane.b32.xlu1 %v4024_v1, %s3962_s26  ;;  %271 = vrot.lane.b32.xlu0 %v4019_v0, %s3962_s26 }
  0x28   :  { %3408 = vrot.lane.b32.xlu1 %v3397_v8, %s3956_s15  ;;  %3403 = vrot.lane.b32.xlu0 %v3397_v8, %s3954_s13 }
  0x2c   :  { %89 = vrot.lane.b32.xlu1 %v4069_v9, %s3954_s13  ;;  %269 = vrot.lane.b32.xlu0 %v4029_v2, %s3962_s26 }
  0x30   :  { %3413 = vrot.lane.b32.xlu1 %v3397_v8, %s3958_s17  ;;  %121 = vrot.lane.b32.xlu0 %v4069_v9, %s3956_s15 }
  0x34   :  { %153 = vrot.lane.b32.xlu1 %v4069_v9, %s3958_s17  ;;  %3418 = vrot.lane.b32.xlu0 %v3397_v8, %s3957_s16 }
  0x38   :  { %3423 = vrot.lane.b32.xlu1 %v3397_v8, %s3960_s19  ;;  %185 = vrot.lane.b32.xlu0 %v4069_v9, %s3957_s16 }
  0x3c   :  { %217 = vrot.lane.b32.xlu1 %v4069_v9, %s3960_s19  ;;  %3428 = vrot.lane.b32.xlu0 %v3397_v8, %s3959_s18 }
  0x40   :  { %275 = vrot.lane.b32.xlu1 %v4036_v4, %s3962_s26  ;;  %249 = vrot.lane.b32.xlu0 %v4069_v9, %s3959_s18 }
  0x44   :  { %59 = vrot.lane.b32.xlu1 %v4105_v11, %s3955_s14  ;;  %277 = vrot.lane.b32.xlu0 %v4055_v6, %s3962_s26 }
  0x48   :  { %281 = vrot.lane.b32.xlu1 %v4069_v9, %s3962_s26  ;;  %279 = vrot.lane.b32.xlu0 %v4060_v7, %s3962_s26 }
  0x4c   :  { %123 = vrot.lane.b32.xlu1 %v4105_v11, %s3956_s15  ;;  %91 = vrot.lane.b32.xlu0 %v4105_v11, %s3954_s13 }
  0x50   :  { %187 = vrot.lane.b32.xlu1 %v4105_v11, %s3957_s16  ;;  %155 = vrot.lane.b32.xlu0 %v4105_v11, %s3958_s17  ;;  %s3967_s16 = smov 60   ;;  %s3968_s17 = smov 62  }
  0x54   :  { %251 = vrot.lane.b32.xlu1 %v4105_v11, %s3959_s18  ;;  %219 = vrot.lane.b32.xlu0 %v4105_v11, %s3960_s19 }
  0x58   :  { %283 = vrot.lane.b32.xlu0 %v4105_v11, %s3962_s26  ;;  %307 = vperm.xlu1 %3432, %v303_v13  }
  0x5c   :  { %312 = vperm.xlu0 %3433, %v304_v14  }
  0x76   :  { %v4135_v15 = vpop.permute.xlu1 %3338  ;;  %v4137_v16 = vpop.permute.xlu0 %3328 }
  0x77   :  { %v3341_v17 = vunpack.i.h.bf16 %v4135_v15  ;;  %v3340_v18 = vunpack.i.l.bf16 %v4135_v15  ;;  %v3331_v19 = vunpack.i.h.bf16 %v4137_v16  ;;  %v3330_v20 = vunpack.i.l.bf16 %v4137_v16 }
  0x79   :  { %v63_v21 = vsel %vm61_vm0, %v3330_v20, %v3331_v19  ;;  %v95_v28 = vsel %vm93_vm1, %v3340_v18, %v3341_v17 }
  0x7a   :  { %v4146_v22 = vpop.permute.xlu1 %3343  ;;  %v4148_v23 = vpop.permute.xlu0 %3333  ;;  %v2976_v24 = vpack.c.bf16 %v63_v21, %v4019_v0 }
  0x7b   :  { %v3346_v25 = vunpack.i.h.bf16 %v4146_v22  ;;  %v3345_v26 = vunpack.i.l.bf16 %v4146_v22  ;;  %v3335_v27 = vunpack.i.l.bf16 %v4148_v23  ;;  %v3336_v12 = vunpack.i.h.bf16 %v4148_v23 }
  0x7c   :  { %2977 = vmatprep.subr.bf16.mxu0 %v2976_v24 }
  0x7d   :  { %v62_v29 = vsel %vm61_vm0, %v3335_v27, %v3330_v20  ;;  %v127_v30 = vsel %vm125_vm2, %v3345_v26, %v3346_v25 }
  0x7e   :  { %v4161_v31 = vpop.permute.xlu1 %3353  ;;  %v4163_v32 = vpop.permute.xlu0 %3348  ;;  %v2978_v33 = vpack.c.bf16 %v62_v29, %v4029_v2  ;;  %v2980_v34 = vpack.c.bf16 %v127_v30, %v95_v28 }
  0x7f   :  { %v3355_v35 = vunpack.i.l.bf16 %v4161_v31  ;;  %v3350_v36 = vunpack.i.l.bf16 %v4163_v32 }
  0x80   :  { %2979 = vmatpush1.bf16.msra.mxu0 %v2978_v33 }
  0x81   :  { %2981 = vmatprep.subr.bf16.mxu0 %v2980_v34  ;;  %v94_v37 = vsel %vm93_vm1, %v3350_v36, %v3340_v18  ;;  %v126_v38 = vsel %vm125_vm2, %v3355_v35, %v3345_v26  ;;  %v64_v26 = vsel %vm61_vm0, %v3331_v19, %v3336_v12  ;;  %v3356_v34 = vunpack.i.h.bf16 %v4161_v31 }
  0x82   :  { %v4170_v39 = vpop.permute.xlu1 %3363  ;;  %v4172_v40 = vpop.permute.xlu0 %3358  ;;  %v2982_v41 = vpack.c.bf16 %v126_v38, %v94_v37  ;;  %v2994_v33 = vpack.c.bf16 %v64_v26, %v4024_v1  ;;  %v3351_v35 = vunpack.i.h.bf16 %v4163_v32 }
  0x83   :  { %v3366_v42 = vunpack.i.h.bf16 %v4170_v39  ;;  %v3365_v43 = vunpack.i.l.bf16 %v4170_v39  ;;  %v3361_v44 = vunpack.i.h.bf16 %v4172_v40  ;;  %v3360_v45 = vunpack.i.l.bf16 %v4172_v40 }
  0x84   :  { %2983 = vmatpush1.bf16.msra.mxu0 %v2982_v41  ;;  %v128_v1 = vsel %vm125_vm2, %v3346_v25, %v3356_v34 }
  0x85   :  { %v159_v46 = vsel %vm157_vm3, %v3360_v45, %v3361_v44  ;;  %v191_v47 = vsel %vm189_vm4, %v3365_v43, %v3366_v42 }
  0x86   :  { %v4184_v48 = vpop.permute.xlu1 %3373  ;;  %v4186_v49 = vpop.permute.xlu0 %3368  ;;  %v2984_v50 = vpack.c.bf16 %v191_v47, %v159_v46 }
  0x87   :  { %v3375_v51 = vunpack.i.l.bf16 %v4184_v48  ;;  %v3370_v52 = vunpack.i.l.bf16 %v4186_v49 }
  0x88   :  { %2985 = vmatprep.subr.bf16.mxu0 %v2984_v50 }
  0x89   :  { %v158_v53 = vsel %vm157_vm3, %v3370_v52, %v3360_v45  ;;  %v190_v54 = vsel %vm189_vm4, %v3375_v51, %v3365_v43  ;;  %v4247_v51 = vld [vmem:[%s6209_s1] sm:$0xff] }
  0x8a   :  { %v4192_v55 = vpop.permute.xlu1 %3383  ;;  %v4194_v56 = vpop.permute.xlu0 %3378  ;;  %v2986_v57 = vpack.c.bf16 %v190_v54, %v158_v53 }
  0x8b   :  { %v3386_v58 = vunpack.i.h.bf16 %v4192_v55  ;;  %v3385_v59 = vunpack.i.l.bf16 %v4192_v55  ;;  %v3381_v60 = vunpack.i.h.bf16 %v4194_v56  ;;  %v3380_v61 = vunpack.i.l.bf16 %v4194_v56 }
  0x8c   :  { %2987 = vmatpush1.bf16.msra.mxu0 %v2986_v57 }
  0x8d   :  { %v223_v62 = vsel %vm221_vm5, %v3380_v61, %v3381_v60  ;;  %v255_v63 = vsel %vm253_vm6, %v3385_v59, %v3386_v58 }
  0x8e   :  { %v4206_v0 = vpop.permute.xlu1 %3393  ;;  %v4208_v2 = vpop.permute.xlu0 %3388  ;;  %v2988_v3 = vpack.c.bf16 %v255_v63, %v223_v62  ;;  %v3376_v62 = vunpack.i.h.bf16 %v4184_v48  ;;  %v3371_v63 = vunpack.i.h.bf16 %v4186_v49 }
  0x8f   :  { %v3395_v5 = vunpack.i.l.bf16 %v4206_v0  ;;  %v3390_v8 = vunpack.i.l.bf16 %v4208_v2 }
  0x90   :  { %2989 = vmatprep.subr.bf16.mxu0 %v2988_v3  ;;  %v160_v48 = vsel %vm157_vm3, %v3361_v44, %v3371_v63  ;;  %v192_v49 = vsel %vm189_vm4, %v3366_v42, %v3376_v62  ;;  %v3396_v42 = vunpack.i.h.bf16 %v4206_v0 }
  0x91   :  { %v222_v13 = vsel %vm221_vm5, %v3390_v8, %v3380_v61  ;;  %v254_v14 = vsel %vm253_vm6, %v3395_v5, %v3385_v59  ;;  %v3002_v44 = vpack.c.bf16 %v192_v49, %v160_v48 }
  0x92   :  { %v4215_v18 = vpop.permute.xlu1 %57  ;;  %v3399_v20 = vpop.permute.xlu0 %3398  ;;  %v2990_v21 = vpack.c.bf16 %v254_v14, %v222_v13  ;;  %v256_v0 = vsel %vm253_vm6, %v3386_v58, %v3396_v42 }
  0x93   :  { %v3400_v24 = vunpack.i.l.bf16 %v3399_v20  ;;  %v3401_v36 = vunpack.i.h.bf16 %v3399_v20 }
  0x94   :  { %2991 = vmatpush1.bf16.msra.mxu0 %v2990_v21 }
  0x95   :  { %v65_v27 = vsel %vm61_vm0, %v3336_v12, %v3400_v24  ;;  %v67_v31 = vsel %vm61_vm0, %v3401_v36, %v4215_v18  ;;  %v66_v43 = vsel %vm61_vm0, %v3400_v24, %v3401_v36 }
  0x96   :  { %v4221_v28 = vpop.permute.xlu1 %273  ;;  %v272_v23 = vpop.permute.xlu0 %271  ;;  %v2992_v29 = vpack.c.bf16 %v65_v27, %v4036_v4  ;;  %v96_v4 = vsel %vm93_vm1, %v3341_v17, %v3351_v35  ;;  %v3008_v25 = vpack.c.bf16 %v67_v31, %v4060_v7  ;;  %v3010_v52 = vpack.c.bf16 %v66_v43, %v4055_v6  ;;  %v4264_v6 = vld [vmem:[%s6209_s1 + $0x8] sm:$0xff]  ;;  %s3964_s1 = smov 124  }
  0x97   :  { %v287_v30 = vsel %vm285_vm7, %v272_v23, %v4221_v28  ;;  %v2998_v22 = vpack.c.bf16 %v128_v1, %v96_v4 }
  0x98   :  { %338 = vmatprep.subr.mxu0 %v287_v30  ;;  %2993 = vmatprep.subr.bf16.mxu1 %v2992_v29 }
  0x99   :  { %2995 = vmatpush1.bf16.msra.mxu1 %v2994_v33 }
  0x9a   :  { %v3409_v16 = vpop.permute.xlu1 %3408  ;;  %v3404_v19 = vpop.permute.xlu0 %3403 }
  0x9b   :  { %v3410_v37 = vunpack.i.l.bf16 %v3409_v16  ;;  %v3405_v38 = vunpack.i.l.bf16 %v3404_v19  ;;  %v3411_v45 = vunpack.i.h.bf16 %v3409_v16  ;;  %v3406_v46 = vunpack.i.h.bf16 %v3404_v19 }
  0x9d   :  { %v97_v32 = vsel %vm93_vm1, %v3351_v35, %v3405_v38  ;;  %v129_v41 = vsel %vm125_vm2, %v3356_v34, %v3410_v37  ;;  %v130_v53 = vsel %vm125_vm2, %v3410_v37, %v3411_v45  ;;  %v98_v54 = vsel %vm93_vm1, %v3405_v38, %v3406_v46 }
  0x9e   :  { %v4240_v47 = vpop.permute.xlu1 %89  ;;  %v270_v15 = vpop.permute.xlu0 %269  ;;  %v2996_v50 = vpack.c.bf16 %v129_v41, %v97_v32  ;;  %v3014_v8 = vpack.c.bf16 %v130_v53, %v98_v54  ;;  %v3391_v34 = vunpack.i.h.bf16 %v4208_v2 }
  0x9f   :  { %v286_v17 = vsel %vm285_vm7, %v270_v15, %v272_v23  ;;  %v99_v7 = vsel %vm93_vm1, %v3406_v46, %v4240_v47 }
  0xa0   :  { %339 = vmatpush1.msra.mxu0 %v286_v17  ;;  %2997 = vmatprep.subr.bf16.mxu1 %v2996_v50  ;;  %v224_v31 = vsel %vm221_vm5, %v3381_v60, %v3391_v34 }
  0xa1   :  { %2999 = vmatpush1.bf16.msra.mxu1 %v2998_v22  ;;  %3009 = vmatprep.subr.bf16.mxu0 %v3008_v25  ;;  %v3006_v50 = vpack.c.bf16 %v256_v0, %v224_v31 }
  0xa2   :  { %v3414_v57 = vpop.permute.xlu1 %3413  ;;  %v4252_v59 = vpop.permute.xlu0 %121  ;;  %2748 = vmatmul.mubr.msk.f32.vlgmr.msra.gmra.mrb[0].mxu0 %vm315_vm8, %v4247_v51 }
  0xa3   :  { %v131_v61 = vsel %vm125_vm2, %v3411_v45, %v4252_v59  ;;  %3011 = vmatpush1.bf16.msra.mxu0 %v3010_v52  ;;  %392 = vmatprep.mubr.f32.mxu0 %v6216_v10  ;;  %v3415_v5 = vunpack.i.l.bf16 %v3414_v57  ;;  %v3416_v12 = vunpack.i.h.bf16 %v3414_v57 }
  0xa4   :  { %v3012_v3 = vpack.c.bf16 %v131_v61, %v99_v7 }
  0xa5   :  { %v161_v24 = vsel %vm157_vm3, %v3371_v63, %v3415_v5  ;;  %v162_v27 = vsel %vm157_vm3, %v3415_v5, %v3416_v12 }
  0xa6   :  { %v4268_v13 = vpop.permute.xlu1 %153  ;;  %v3419_v14 = vpop.permute.xlu0 %3418  ;;  %3013 = vmatprep.subr.bf16.mxu0 %v3012_v3  ;;  %2749 = vmatmul.mubr.msk.f32.gmra.mrb[2].mxu0 %vm315_vm8, %v4264_v6 }
  0xa7   :  { %v3421_v20 = vunpack.i.h.bf16 %v3419_v14  ;;  %v3420_v21 = vunpack.i.l.bf16 %v3419_v14  ;;  %3015 = vmatpush1.bf16.msra.mxu0 %v3014_v8  ;;  %540 = vmatprep.mubr.f32.mxu0 %v6216_v10  ;;  %v163_v40 = vsel %vm157_vm3, %v3416_v12, %v4268_v13 }
  0xa9   :  { %v193_v26 = vsel %vm189_vm4, %v3376_v62, %v3420_v21  ;;  %v194_v23 = vsel %vm189_vm4, %v3420_v21, %v3421_v20 }
  0xaa   :  { %v3424_v29 = vpop.permute.xlu1 %3423  ;;  %v4283_v30 = vpop.permute.xlu0 %185  ;;  %v3000_v33 = vpack.c.bf16 %v193_v26, %v161_v24  ;;  %v3018_v16 = vpack.c.bf16 %v194_v23, %v162_v27 }
  0xab   :  { %v195_v39 = vsel %vm189_vm4, %v3421_v20, %v4283_v30  ;;  %v3425_v36 = vunpack.i.l.bf16 %v3424_v29  ;;  %v3426_v19 = vunpack.i.h.bf16 %v3424_v29 }
  0xac   :  { %3001 = vmatprep.subr.bf16.mxu1 %v3000_v33  ;;  %v3016_v35 = vpack.c.bf16 %v195_v39, %v163_v40 }
  0xad   :  { %3003 = vmatpush1.bf16.msra.mxu1 %v3002_v44  ;;  %v225_v2 = vsel %vm221_vm5, %v3391_v34, %v3425_v36  ;;  %v226_v41 = vsel %vm221_vm5, %v3425_v36, %v3426_v19 }
  0xae   :  { %v4291_v37 = vpop.permute.xlu1 %217  ;;  %v3429_v38 = vpop.permute.xlu0 %3428  ;;  %3017 = vmatprep.subr.bf16.mxu0 %v3016_v35 }
  0xaf   :  { %v3431_v4 = vunpack.i.h.bf16 %v3429_v38  ;;  %v3430_v1 = vunpack.i.l.bf16 %v3429_v38  ;;  %3019 = vmatpush1.bf16.msra.mxu0 %v3018_v16  ;;  %v227_v56 = vsel %vm221_vm5, %v3426_v19, %v4291_v37 }
  0xb1   :  { %v257_v32 = vsel %vm253_vm6, %v3396_v42, %v3430_v1  ;;  %v258_v43 = vsel %vm253_vm6, %v3430_v1, %v3431_v4 }
  0xb2   :  { %v276_v45 = vpop.permute.xlu1 %275  ;;  %v250_v46 = vpop.permute.xlu0 %249  ;;  %v3004_v15 = vpack.c.bf16 %v257_v32, %v225_v2  ;;  %v3022_v58 = vpack.c.bf16 %v258_v43, %v226_v41 }
  0xb3   :  { %v259_v60 = vsel %vm253_vm6, %v3431_v4, %v250_v46  ;;  %v288_v57 = vsel %vm285_vm7, %v4221_v28, %v276_v45 }
  0xb4   :  { %3005 = vmatprep.subr.bf16.mxu1 %v3004_v15  ;;  %v3020_v55 = vpack.c.bf16 %v259_v60, %v227_v56 }
  0xb5   :  { %3007 = vmatpush1.bf16.msra.mxu1 %v3006_v50 }
  0xb6   :  { %v60_v17 = vpop.permute.xlu1 %59  ;;  %v278_v22 = vpop.permute.xlu0 %277  ;;  %3021 = vmatprep.subr.bf16.mxu0 %v3020_v55 }
  0xb7   :  { %v68_v25 = vsel %vm61_vm0, %v4215_v18, %v60_v17  ;;  %v3024_v52 = vpack.c.bf16 %v60_v17, %v4105_v11  ;;  %3023 = vmatpush1.bf16.msra.mxu0 %v3022_v58  ;;  %v289_v53 = vsel %vm285_vm7, %v276_v45, %v278_v22 }
  0xb8   :  { %v3026_v54 = vpack.c.bf16 %v68_v25, %v4069_v9  ;;  %415 = vmatprep.subr.mxu1 %v289_v53 }
  0xb9   :  { %416 = vmatpush1.msra.mxu1 %v288_v57 }
  0xba   :  { %v282_v7 = vpop.permute.xlu1 %281  ;;  %v280_v61 = vpop.permute.xlu0 %279  ;;  %2750 = vmatmul.mubr.msk.f32.vlgmr.msra.gmra.mrb[0].mxu1 %vm315_vm8, %v4247_v51  ;;  %3025 = vmatprep.subr.bf16.mxu1 %v3024_v52 }
  0xbb   :  { %3027 = vmatpush1.bf16.msra.mxu1 %v3026_v54  ;;  %v291_v18 = vsel %vm285_vm7, %v280_v61, %v282_v7  ;;  %469 = vmatprep.mubr.f32.mxu1 %v6216_v10  ;;  %v290_v11 = vsel %vm285_vm7, %v278_v22, %v280_v61 }
  0xbc   :  { %492 = vmatprep.subr.mxu0 %v291_v18 }
  0xbd   :  { %493 = vmatpush1.msra.mxu0 %v290_v11 }
  0xbe   :  { %v124_v9 = vpop.permute.xlu1 %123  ;;  %v92_v62 = vpop.permute.xlu0 %91  ;;  %2751 = vmatmul.mubr.msk.f32.gmra.mrb[2].mxu1 %vm315_vm8, %v4264_v6  ;;  %2752 = vmatmul.mubr.msk.f32.vlgmr.msra.gmra.mrb[4].mxu0 %vm315_vm8, %v4247_v51 }
  0xbf   :  { %v132_v28 = vsel %vm125_vm2, %v4252_v59, %v124_v9  ;;  %v100_v63 = vsel %vm93_vm1, %v4240_v47, %v92_v62  ;;  %v3028_v3 = vpack.c.bf16 %v124_v9, %v92_v62  ;;  %546 = vmatprep.mubr.f32.mxu0 %v6216_v10  ;;  %617 = vmatprep.mubr.f32.mxu1 %v6216_v10 }
  0xc0   :  { %v3030_v5 = vpack.c.bf16 %v132_v28, %v100_v63 }
  0xc1   :  { %3029 = vmatprep.subr.bf16.mxu1 %v3028_v3 }
  0xc2   :  { %v188_v8 = vpop.permute.xlu1 %187  ;;  %v156_v12 = vpop.permute.xlu0 %155  ;;  %2753 = vmatmul.mubr.msk.f32.gmra.mrb[6].mxu0 %vm315_vm8, %v4264_v6  ;;  %3031 = vmatpush1.bf16.msra.mxu1 %v3030_v5 }
  0xc3   :  { %v196_v14 = vsel %vm189_vm4, %v4283_v30, %v188_v8  ;;  %v164_v59 = vsel %vm157_vm3, %v4268_v13, %v156_v12  ;;  %v3032_v47 = vpack.c.bf16 %v188_v8, %v156_v12 }
  0xc4   :  { %v3034_v20 = vpack.c.bf16 %v196_v14, %v164_v59 }
  0xc5   :  { %3033 = vmatprep.subr.bf16.mxu1 %v3032_v47 }
  0xc6   :  { %v252_v21 = vpop.permute.xlu1 %251  ;;  %v220_v48 = vpop.permute.xlu0 %219  ;;  %3035 = vmatpush1.bf16.msra.mxu1 %v3034_v20 }
  0xc7   :  { %v260_v49 = vsel %vm253_vm6, %v250_v46, %v252_v21  ;;  %v228_v24 = vsel %vm221_vm5, %v4291_v37, %v220_v48  ;;  %v3036_v26 = vpack.c.bf16 %v252_v21, %v220_v48 }
  0xc8   :  { %v3038_v27 = vpack.c.bf16 %v260_v49, %v228_v24 }
  0xc9   :  { %3037 = vmatprep.subr.bf16.mxu1 %v3036_v26 }
  0xca   :  { %v284_v23 = vpop.permute.xlu0 %283  ;;  %3039 = vmatpush1.bf16.msra.mxu1 %v3038_v27 }
  0xcb   :  { %569 = vmatprep.subr.mxu1 %v284_v23  ;;  %v292_v29 = vsel %vm285_vm7, %v282_v7, %v284_v23 }
  0xce   :  { %570 = vmatpush1.msra.mxu1 %v292_v29 }
  0xcf   :  { %2754 = vmatmul.mubr.msk.f32.vlgmr.msra.gmra.mrb[4].mxu1 %vm315_vm8, %v4247_v51 }
  0xd0   :  { %623 = vmatprep.mubr.f32.mxu1 %v6216_v10 }
  0xd3   :  { %2755 = vmatmul.mubr.msk.f32.gmra.mrb[6].mxu1 %vm315_vm8, %v4264_v6 }
  0xd7   :  { %v308_v39 = vpop.permute.xlu1 %307 }
  0xdb   :  { %v313_v42 = vpop.permute.xlu0 %312 }
 0x175   :  { %v388_v13 = vpop.f32.mrb[0].mxu0 }
 0x176   :  { %v390_v30 = vpop.f32.mrb[1].mxu0  ;;  %v4353_v6 = vadd.f32 %v388_v13, %v308_v39 }
 0x177   :  { %v4343_v44 = vadd.f32 %v390_v30, %v308_v39 }
 0x178   :  { %v630_v60 = vmax.f32 %v4353_v6, 0.0 }
 0x179   :  { %v394_v33 = vpop.f32.mrb[2].mxu0  ;;  %v631_v51 = vmax.f32 %v4343_v44, 0.0 }
 0x17a   :  { %v396_v40 = vpop.f32.mrb[3].mxu0  ;;  %v4355_v38 = vadd.f32 %v394_v33, %v313_v42 }
 0x17b   :  { %v4347_v16 = vadd.f32 %v396_v40, %v313_v42 }
 0x17c   :  { %v638_v55 = vmax.f32 %v4355_v38, 0.0 }
 0x17d   :  { %v639_v0 = vmax.f32 %v4347_v16, 0.0 }
 0x17e   :  { %v3454_v54 = vpack.i.bf16 %v638_v55, %v630_v60 }
 0x18d   :  { %v465_v34 = vpop.f32.mrb[0].mxu1 }
 0x18e   :  { %v4345_v35 = vadd.f32 %v465_v34, %v308_v39  ;;  %v467_v36 = vpop.f32.mrb[1].mxu1 }
 0x18f   :  { %v4351_v37 = vadd.f32 %v467_v36, %v308_v39 }
 0x190   :  { %v632_v19 = vmax.f32 %v4345_v35, 0.0 }
 0x191   :  { %v471_v4 = vpop.f32.mrb[2].mxu1  ;;  %v542_v1 = vpop.f32.mrb[4].mxu0  ;;  %v633_v45 = vmax.f32 %v4351_v37, 0.0 }
 0x192   :  { %v3434_v31 = vpack.i.bf16 %v632_v19, %v631_v51  ;;  %v4362_v2 = vadd.f32 %v471_v4, %v313_v42  ;;  %v4364_v32 = vadd.f32 %v542_v1, %v308_v39  ;;  %v473_v41 = vpop.f32.mrb[3].mxu1  ;;  %v544_v43 = vpop.f32.mrb[5].mxu0 }
 0x193   :  { %v4369_v56 = vadd.f32 %v473_v41, %v313_v42  ;;  %v4396_v7 = vadd.f32 %v544_v43, %v308_v39 }
 0x194   :  { %v640_v46 = vmax.f32 %v4362_v2, 0.0  ;;  %v634_v15 = vmax.f32 %v4364_v32, 0.0  ;;  %3435 = vrot.lane.b32.xlu1 %v3434_v31, %s3955_s14 }
 0x195   :  { %v548_v50 = vpop.f32.mrb[6].mxu0  ;;  %v641_v52 = vmax.f32 %v4369_v56, 0.0  ;;  %v635_v9 = vmax.f32 %v4396_v7, 0.0 }
 0x196   :  { %v3439_v58 = vpack.i.bf16 %v640_v46, %v639_v0  ;;  %v3444_v17 = vpack.i.bf16 %v634_v15, %v633_v45  ;;  %v4382_v22 = vadd.f32 %v548_v50, %v313_v42  ;;  %v550_v25 = vpop.f32.mrb[7].mxu0 }
 0x197   :  { %v4401_v62 = vadd.f32 %v550_v25, %v313_v42 }
 0x198   :  { %v642_v53 = vmax.f32 %v4382_v22, 0.0  ;;  %3440 = vrot.lane.b32.xlu0 %v3439_v58, %s3955_s14  ;;  %3445 = vrot.lane.b32.xlu1 %v3444_v17, %s3955_s14 }
 0x199   :  { %v643_v59 = vmax.f32 %v4401_v62, 0.0 }
 0x19a   :  { %v3449_v57 = vpack.i.bf16 %v642_v53, %v641_v52 }
 0x19c   :  { %3450 = vrot.lane.b32.xlu1 %v3449_v57, %s3955_s14  ;;  %3455 = vrot.lane.b32.xlu0 %v3454_v54, %s3955_s14 }
 0x1a2   :  { %v619_v61 = vpop.f32.mrb[4].mxu1 }
 0x1a3   :  { %v4398_v18 = vadd.f32 %v619_v61, %v308_v39  ;;  %v621_v11 = vpop.f32.mrb[5].mxu1 }
 0x1a4   :  { %v4404_v63 = vadd.f32 %v621_v11, %v308_v39 }
 0x1a5   :  { %v636_v28 = vmax.f32 %v4398_v18, 0.0 }
 0x1a6   :  { %v625_v3 = vpop.f32.mrb[6].mxu1  ;;  %v637_v20 = vmax.f32 %v4404_v63, 0.0 }
 0x1a7   :  { %v3459_v5 = vpack.i.bf16 %v636_v28, %v635_v9  ;;  %v4410_v8 = vadd.f32 %v625_v3, %v313_v42  ;;  %v627_v12 = vpop.f32.mrb[7].mxu1 }
 0x1a8   :  { %v4412_v14 = vadd.f32 %v627_v12, %v313_v42 }
 0x1a9   :  { %v644_v47 = vmax.f32 %v4410_v8, 0.0  ;;  %3460 = vrot.lane.b32.xlu1 %v3459_v5, %s3955_s14 }
 0x1aa   :  { %v645_v21 = vmax.f32 %v4412_v14, 0.0 }
 0x1ab   :  { %v3464_v48 = vpack.i.bf16 %v644_v47, %v643_v59 }
 0x1ac   :  { %v3469_v49 = vpack.i.bf16 %v645_v21, %v637_v20 }
 0x1ad   :  { %3465 = vrot.lane.b32.xlu0 %v3464_v48, %s3955_s14 }
 0x1ae   :  { %3470 = vrot.lane.b32.xlu1 %v3469_v49, %s3955_s14  ;;  %s3965_s14 = smov 64  }
 0x206   :  { %v3436_v24 = vpop.permute.xlu1 %3435 }
 0x207   :  { %v3438_v26 = vunpack.i.h.bf16 %v3436_v24  ;;  %v3437_v27 = vunpack.i.l.bf16 %v3436_v24 }
 0x209   :  { %v695_v30 = vsel %vm61_vm0, %v3437_v27, %v3438_v26 }
 0x20a   :  { %v3441_v23 = vpop.permute.xlu0 %3440  ;;  %v3446_v29 = vpop.permute.xlu1 %3445  ;;  %v4431_v4 = vmax.f32 %v631_v51, %v695_v30 }
 0x20b   :  { %v3447_v13 = vunpack.i.l.bf16 %v3446_v29  ;;  %v3443_v33 = vunpack.i.h.bf16 %v3441_v23  ;;  %v3442_v40 = vunpack.i.l.bf16 %v3441_v23  ;;  %v3448_v39 = vunpack.i.h.bf16 %v3446_v29 }
 0x20d   :  { %v696_v42 = vsel %vm61_vm0, %v3438_v26, %v3447_v13  ;;  %v697_v58 = vsel %vm61_vm0, %v3447_v13, %v3448_v39  ;;  %v702_v17 = vsel %vm61_vm0, %v3442_v40, %v3443_v33 }
 0x20e   :  { %v3451_v34 = vpop.permute.xlu1 %3450  ;;  %v3456_v36 = vpop.permute.xlu0 %3455  ;;  %v4435_v1 = vmax.f32 %v632_v19, %v696_v42  ;;  %v4460_v3 = vmax.f32 %v633_v45, %v697_v58  ;;  %v733_v2 = vmax.f32 %v639_v0, %v702_v17 }
 0x20f   :  { %v3453_v31 = vunpack.i.h.bf16 %v3451_v34  ;;  %v3452_v41 = vunpack.i.l.bf16 %v3451_v34  ;;  %v3458_v43 = vunpack.i.h.bf16 %v3456_v36  ;;  %v3457_v56 = vunpack.i.l.bf16 %v3456_v36 }
 0x210   :  { %v3474_v50 = vpack.i.bf16 %v4435_v1, %v4431_v4  ;;  %v3484_v6 = vpack.i.bf16 %v733_v2, %v4460_v3 }
 0x211   :  { %v703_v25 = vsel %vm61_vm0, %v3443_v33, %v3452_v41  ;;  %v704_v44 = vsel %vm61_vm0, %v3452_v41, %v3453_v31  ;;  %v694_v51 = vsel %vm61_vm0, %v3457_v56, %v3437_v27  ;;  %v701_v35 = vsel %vm61_vm0, %v3458_v43, %v3442_v40 }
 0x212   :  { %3475 = vrot.lane.b32.xlu0 %v3474_v50, %s3956_s15  ;;  %v4448_v19 = vmax.f32 %v640_v46, %v703_v25  ;;  %v4450_v54 = vmax.f32 %v641_v52, %v704_v44  ;;  %v724_v57 = vmax.f32 %v630_v60, %v694_v51  ;;  %v732_v61 = vmax.f32 %v638_v55, %v701_v35 }
 0x214   :  { %v3489_v11 = vpack.i.bf16 %v4450_v54, %v4448_v19  ;;  %v3479_v63 = vpack.i.bf16 %v732_v61, %v724_v57 }
 0x216   :  { %3490 = vrot.lane.b32.xlu0 %v3489_v11, %s3956_s15  ;;  %3480 = vrot.lane.b32.xlu1 %v3479_v63, %s3956_s15 }
 0x21a   :  { %3485 = vrot.lane.b32.xlu1 %v3484_v6, %s3956_s15 }
 0x21b   :  { %v3461_v38 = vpop.permute.xlu1 %3460 }
 0x21c   :  { %v3463_v46 = vunpack.i.h.bf16 %v3461_v38  ;;  %v3462_v60 = vunpack.i.l.bf16 %v3461_v38 }
 0x21e   :  { %v698_v55 = vsel %vm61_vm0, %v3448_v39, %v3462_v60  ;;  %v699_v37 = vsel %vm61_vm0, %v3462_v60, %v3463_v46 }
 0x21f   :  { %v3466_v45 = vpop.permute.xlu0 %3465  ;;  %v4472_v16 = vmax.f32 %v634_v15, %v698_v55  ;;  %v4476_v0 = vmax.f32 %v635_v9, %v699_v37 }
 0x220   :  { %v3468_v52 = vunpack.i.h.bf16 %v3466_v45  ;;  %v3467_v5 = vunpack.i.l.bf16 %v3466_v45  ;;  %v3471_v12 = vpop.permute.xlu1 %3470 }
 0x221   :  { %v3473_v48 = vunpack.i.h.bf16 %v3471_v12  ;;  %v3472_v49 = vunpack.i.l.bf16 %v3471_v12  ;;  %v3494_v24 = vpack.i.bf16 %v4476_v0, %v4472_v16 }
 0x222   :  { %v705_v26 = vsel %vm61_vm0, %v3453_v31, %v3467_v5  ;;  %v706_v27 = vsel %vm61_vm0, %v3467_v5, %v3468_v52 }
 0x223   :  { %v4482_v23 = vmax.f32 %v637_v20, %v3472_v49  ;;  %3495 = vrot.lane.b32.xlu0 %v3494_v24, %s3956_s15  ;;  %v4487_v32 = vmax.f32 %v642_v53, %v705_v26  ;;  %v4491_v15 = vmax.f32 %v643_v59, %v706_v27  ;;  %v700_v7 = vsel %vm61_vm0, %v3463_v46, %v3472_v49 }
 0x224   :  { %v707_v9 = vsel %vm61_vm0, %v3468_v52, %v3473_v48  ;;  %v4497_v29 = vmax.f32 %v645_v21, %v3473_v48  ;;  %v4503_v22 = vmax.f32 %v636_v28, %v700_v7  ;;  %vm2269_vm0 = vcmask 842752  }
 0x225   :  { %v3504_v20 = vpack.i.bf16 %v4491_v15, %v4487_v32  ;;  %v4507_v53 = vmax.f32 %v644_v47, %v707_v9 }
 0x226   :  { %v3499_v62 = vpack.i.bf16 %v4482_v23, %v4503_v22 }
 0x227   :  { %3505 = vrot.lane.b32.xlu1 %v3504_v20, %s3956_s15  ;;  %v3509_v14 = vpack.i.bf16 %v4497_v29, %v4507_v53 }
 0x228   :  { %3500 = vrot.lane.b32.xlu0 %v3499_v62, %s3956_s15 }
 0x22b   :  { %3510 = vrot.lane.b32.xlu1 %v3509_v14, %s3956_s15  ;;  %s3966_s15 = smov 92  }
 0x284   :  { %v3476_v59 = vpop.permute.xlu0 %3475 }
 0x285   :  { %v3478_v18 = vunpack.i.h.bf16 %v3476_v59  ;;  %v3477_v28 = vunpack.i.l.bf16 %v3476_v59 }
 0x287   :  { %v789_v47 = vsel %vm125_vm2, %v3477_v28, %v3478_v18 }
 0x288   :  { %v3481_v21 = vpop.permute.xlu1 %3480  ;;  %v3491_v8 = vpop.permute.xlu0 %3490  ;;  %v819_v31 = vmax.f32 %v4431_v4, %v789_v47  ;;  %v4622_v47 = vld [vmem:[%s6210_s3 + $0x8] sm:$0xff] }
 0x289   :  { %v3482_v13 = vunpack.i.l.bf16 %v3481_v21  ;;  %v3492_v33 = vunpack.i.l.bf16 %v3491_v8  ;;  %v3483_v40 = vunpack.i.h.bf16 %v3481_v21  ;;  %v3493_v51 = vunpack.i.h.bf16 %v3491_v8  ;;  %2756 = vmatprep.mubr.msk.f32.mxu0 %vm1383_vm9, %v4622_v47  ;;  %2760 = vmatprep.mubr.msk.f32.mxu1 %vm1383_vm9, %v4622_v47 }
 0x28b   :  { %v788_v39 = vsel %vm125_vm2, %v3482_v13, %v3477_v28 }
 0x28c   :  { %v3486_v30 = vpop.permute.xlu1 %3485  ;;  %v818_v41 = vmax.f32 %v724_v57, %v788_v39 }
 0x28d   :  { %v3488_v42 = vunpack.i.h.bf16 %v3486_v30  ;;  %v3487_v25 = vunpack.i.l.bf16 %v3486_v30 }
 0x28f   :  { %v796_v34 = vsel %vm125_vm2, %v3488_v42, %v3492_v33  ;;  %v795_v36 = vsel %vm125_vm2, %v3483_v40, %v3488_v42  ;;  %v790_v4 = vsel %vm125_vm2, %v3478_v18, %v3487_v25 }
 0x290   :  { %v4521_v43 = vmax.f32 %v733_v2, %v796_v34  ;;  %v826_v56 = vmax.f32 %v732_v61, %v795_v36  ;;  %v797_v61 = vsel %vm125_vm2, %v3492_v33, %v3493_v51  ;;  %v820_v2 = vmax.f32 %v4435_v1, %v790_v4 }
 0x291   :  { %v828_v46 = vmax.f32 %v4448_v19, %v797_v61 }
 0x292   :  { %v3040_v50 = vpack.c.bf16 %v4521_v43, %v819_v31  ;;  %v3519_v58 = vpack.i.bf16 %v826_v56, %v818_v41  ;;  %v3042_v17 = vpack.c.bf16 %v826_v56, %v818_v41 }
 0x293   :  { %v3078_v1 = vpack.c.bf16 %v828_v46, %v820_v2  ;;  %v3629_v21 = vpack.i.bf16 %v828_v46, %v4521_v43  ;;  %v1359_v43 = vld [vmem:[%s6211_s4] sm:$0xff] }
 0x294   :  { %3041 = vmatprep.subr.bf16.mxu0 %v3040_v50  ;;  %3520 = vrot.lane.b32.xlu1 %v3519_v58, %s3964_s1  ;;  %v1362_v50 = vld [vmem:[%s6211_s4 + $0x18] sm:$0xff] }
 0x295   :  { %3515 = vrot.lane.b32.xlu0 %v3519_v58, %s3954_s13  ;;  %v3496_v44 = vpop.permute.xlu0 %3495  ;;  %3043 = vmatpush1.bf16.msra.mxu0 %v3042_v17  ;;  %v1361_v17 = vld [vmem:[%s6211_s4 + $0x10] sm:$0xff] }
 0x296   :  { %v3497_v35 = vunpack.i.l.bf16 %v3496_v44  ;;  %v3498_v12 = vunpack.i.h.bf16 %v3496_v44 }
 0x298   :  { %3530 = vrot.lane.b32.xlu1 %v3519_v58, %s3962_s26  ;;  %v791_v11 = vsel %vm125_vm2, %v3487_v25, %v3497_v35  ;;  %v792_v62 = vsel %vm125_vm2, %v3497_v35, %v3498_v12 }
 0x299   :  { %3525 = vrot.lane.b32.xlu0 %v3519_v58, %s3960_s19  ;;  %v3506_v57 = vpop.permute.xlu1 %3505  ;;  %v821_v60 = vmax.f32 %v4460_v3, %v791_v11  ;;  %v3559_v3 = vpack.i.bf16 %v820_v2, %v819_v31  ;;  %v1360_v31 = vld [vmem:[%s6211_s4 + $0x8] sm:$0xff] }
 0x29a   :  { %v3507_v63 = vunpack.i.l.bf16 %v3506_v57  ;;  %v3501_v6 = vpop.permute.xlu0 %3500  ;;  %v3508_v48 = vunpack.i.h.bf16 %v3506_v57 }
 0x29b   :  { %v3503_v45 = vunpack.i.h.bf16 %v3501_v6  ;;  %v3502_v52 = vunpack.i.l.bf16 %v3501_v6 }
 0x29c   :  { %v798_v38 = vsel %vm125_vm2, %v3493_v51, %v3507_v63  ;;  %3540 = vrot.lane.b32.xlu1 %v3519_v58, %s3965_s14  ;;  %v799_v26 = vsel %vm125_vm2, %v3507_v63, %v3508_v48 }
 0x29d   :  { %v829_v55 = vmax.f32 %v4450_v54, %v798_v38  ;;  %3535 = vrot.lane.b32.xlu0 %v3519_v58, %s3966_s15  ;;  %v3511_v37 = vpop.permute.xlu1 %3510  ;;  %v793_v19 = vsel %vm125_vm2, %v3498_v12, %v3502_v52  ;;  %v794_v54 = vsel %vm125_vm2, %v3502_v52, %v3503_v45  ;;  %v4555_v14 = vmax.f32 %v4487_v32, %v799_v26 }
 0x29e   :  { %v3513_v49 = vunpack.i.h.bf16 %v3511_v37  ;;  %v3512_v24 = vunpack.i.l.bf16 %v3511_v37  ;;  %v4547_v9 = vmax.f32 %v4476_v0, %v793_v19  ;;  %v4550_v20 = vmax.f32 %v4503_v22, %v794_v54 }
 0x29f   :  { %v3076_v5 = vpack.c.bf16 %v829_v55, %v821_v60  ;;  %v4568_v0 = vmax.f32 %v4472_v16, %v792_v62  ;;  %v4571_v22 = vmax.f32 %v4482_v23, %v3503_v45  ;;  %v3669_v13 = vpack.i.bf16 %v4555_v14, %v829_v55 }
 0x2a0   :  { %3550 = vrot.lane.b32.xlu1 %v3519_v58, %s3967_s16  ;;  %v800_v27 = vsel %vm125_vm2, %v3508_v48, %v3512_v24  ;;  %v801_v7 = vsel %vm125_vm2, %v3512_v24, %v3513_v49  ;;  %6255 = vst [vmem:[#allocation2_spill] sm:$0xff] %v4550_v20  ;;  %v4558_v59 = vmax.f32 %v4497_v29, %v3513_v49  ;;  %vm2669_vm2 = vcmask 261120  }
 0x2a1   :  { %3545 = vrot.lane.b32.xlu0 %v3519_v58, %s3968_s17  ;;  %3077 = vmatprep.subr.bf16.mxu1 %v3076_v5  ;;  %v4561_v18 = vmax.f32 %v4491_v15, %v800_v27  ;;  %v4564_v28 = vmax.f32 %v4507_v53, %v801_v7  ;;  %v4576_v32 = vpack.i.bf16 %v4550_v20, %v4547_v9 }
 0x2a2   :  { %3079 = vmatpush1.bf16.msra.mxu1 %v3078_v1  ;;  %v3599_v23 = vpack.i.bf16 %v4568_v0, %v821_v60  ;;  %v3724_v8 = vpack.i.bf16 %v4558_v59, %v4571_v22 }
 0x2a3   :  { %v3744_v30 = vpack.i.bf16 %v4564_v28, %v4561_v18 }
 0x2a4   :  { %3560 = vrot.lane.b32.xlu1 %v3559_v3, %s3964_s1 }
 0x2a5   :  { %3555 = vrot.lane.b32.xlu0 %v3559_v3, %s3954_s13 }
 0x2a8   :  { %3570 = vrot.lane.b32.xlu1 %v3559_v3, %s3962_s26 }
 0x2a9   :  { %3565 = vrot.lane.b32.xlu0 %v3559_v3, %s3960_s19 }
 0x2ac   :  { %3580 = vrot.lane.b32.xlu1 %v3559_v3, %s3965_s14 }
 0x2ad   :  { %3575 = vrot.lane.b32.xlu0 %v3559_v3, %s3966_s15 }
 0x2b0   :  { %3590 = vrot.lane.b32.xlu1 %v3559_v3, %s3967_s16 }
 0x2b1   :  { %3585 = vrot.lane.b32.xlu0 %v3559_v3, %s3968_s17 }
 0x2b4   :  { %3600 = vrot.lane.b32.xlu1 %v3599_v23, %s3964_s1 }
 0x2b5   :  { %3595 = vrot.lane.b32.xlu0 %v3599_v23, %s3954_s13 }
 0x2b8   :  { %3610 = vrot.lane.b32.xlu1 %v3599_v23, %s3962_s26 }
 0x2b9   :  { %3605 = vrot.lane.b32.xlu0 %v3599_v23, %s3960_s19 }
 0x2bc   :  { %3630 = vrot.lane.b32.xlu1 %v3629_v21, %s3954_s13 }
 0x2bd   :  { %3615 = vrot.lane.b32.xlu0 %v3599_v23, %s3966_s15 }
 0x2c0   :  { %3640 = vrot.lane.b32.xlu1 %v3629_v21, %s3960_s19 }
 0x2c1   :  { %3620 = vrot.lane.b32.xlu0 %v3599_v23, %s3965_s14 }
 0x2c4   :  { %3650 = vrot.lane.b32.xlu1 %v3629_v21, %s3966_s15 }
 0x2c5   :  { %3625 = vrot.lane.b32.xlu0 %v4576_v32, %s3954_s13 }
 0x2c8   :  { %3660 = vrot.lane.b32.xlu1 %v3629_v21, %s3968_s17 }
 0x2c9   :  { %3635 = vrot.lane.b32.xlu0 %v3629_v21, %s3964_s1 }
 0x2cc   :  { %3670 = vrot.lane.b32.xlu1 %v3669_v13, %s3954_s13 }
 0x2cd   :  { %3645 = vrot.lane.b32.xlu0 %v3629_v21, %s3962_s26 }
 0x2d0   :  { %3685 = vrot.lane.b32.xlu1 %v3669_v13, %s3960_s19 }
 0x2d1   :  { %3655 = vrot.lane.b32.xlu0 %v3629_v21, %s3965_s14 }
 0x2d4   :  { %3720 = vrot.lane.b32.xlu1 %v4576_v32, %s3966_s15 }
 0x2d5   :  { %3665 = vrot.lane.b32.xlu0 %v3629_v21, %s3967_s16 }
 0x2d8   :  { %3725 = vrot.lane.b32.xlu1 %v3724_v8, %s3964_s1 }
 0x2d9   :  { %3675 = vrot.lane.b32.xlu0 %v3669_v13, %s3964_s1 }
 0x2dc   :  { %3735 = vrot.lane.b32.xlu1 %v3669_v13, %s3966_s15 }
 0x2dd   :  { %3680 = vrot.lane.b32.xlu0 %v3599_v23, %s3968_s17 }
 0x2e0   :  { %3740 = vrot.lane.b32.xlu1 %v3669_v13, %s3965_s14 }
 0x2e1   :  { %3690 = vrot.lane.b32.xlu0 %v3669_v13, %s3962_s26 }
 0x2e4   :  { %3745 = vrot.lane.b32.xlu1 %v3744_v30, %s3954_s13 }
 0x2e5   :  { %3695 = vrot.lane.b32.xlu0 %v4576_v32, %s3964_s1 }
 0x2e8   :  { %3750 = vrot.lane.b32.xlu1 %v3669_v13, %s3968_s17 }
 0x2e9   :  { %3700 = vrot.lane.b32.xlu0 %v3599_v23, %s3967_s16 }
 0x2ec   :  { %3755 = vrot.lane.b32.xlu1 %v3744_v30, %s3964_s1 }
 0x2ed   :  { %3705 = vrot.lane.b32.xlu0 %v4576_v32, %s3960_s19 }
 0x2f0   :  { %3760 = vrot.lane.b32.xlu1 %v3669_v13, %s3967_s16 }
 0x2f1   :  { %3710 = vrot.lane.b32.xlu0 %v4576_v32, %s3962_s26 }
 0x2f4   :  { %3765 = vrot.lane.b32.xlu1 %v3744_v30, %s3960_s19 }
 0x2f5   :  { %3715 = vrot.lane.b32.xlu0 %v3724_v8, %s3954_s13 }
 0x2f8   :  { %3770 = vrot.lane.b32.xlu1 %v3744_v30, %s3962_s26 }
 0x2f9   :  { %3730 = vrot.lane.b32.xlu0 %v4576_v32, %s3965_s14 }
 0x2fc   :  { %3785 = vrot.lane.b32.xlu1 %v4576_v32, %s3968_s17 }
 0x2fd   :  { %3775 = vrot.lane.b32.xlu0 %v3744_v30, %s3966_s15 }
 0x300   :  { %3790 = vrot.lane.b32.xlu1 %v3744_v30, %s3965_s14 }
 0x301   :  { %3780 = vrot.lane.b32.xlu0 %v3724_v8, %s3960_s19 }
 0x304   :  { %3795 = vrot.lane.b32.xlu1 %v3724_v8, %s3962_s26 }
 0x305   :  { %3800 = vrot.lane.b32.xlu0 %v3744_v30, %s3968_s17 }
 0x306   :  { %v4655_v33 = vpop.permute.xlu1 %3520 }
 0x307   :  { %v3516_v40 = vpop.permute.xlu0 %3515  ;;  %v3523_v26 = vunpack.i.h.bf16 %v4655_v33  ;;  %v3522_v27 = vunpack.i.l.bf16 %v4655_v33 }
 0x308   :  { %3810 = vrot.lane.b32.xlu1 %v3744_v30, %s3967_s16  ;;  %v3518_v55 = vunpack.i.h.bf16 %v3516_v40  ;;  %v3517_v37 = vunpack.i.l.bf16 %v3516_v40 }
 0x309   :  { %3805 = vrot.lane.b32.xlu0 %v4576_v32, %s3967_s16 }
 0x30a   :  { %v4660_v39 = vpop.permute.xlu1 %3530 }
 0x30b   :  { %v4662_v42 = vpop.permute.xlu0 %3525  ;;  %v3532_v32 = vunpack.i.l.bf16 %v4660_v39 }
 0x30c   :  { %3820 = vrot.lane.b32.xlu1 %v3724_v8, %s3965_s14  ;;  %v3527_v30 = vunpack.i.l.bf16 %v4662_v42 }
 0x30d   :  { %3815 = vrot.lane.b32.xlu0 %v3724_v8, %s3966_s15 }
 0x30e   :  { %v4666_v34 = vpop.permute.xlu1 %3540 }
 0x30f   :  { %v4668_v36 = vpop.permute.xlu0 %3535  ;;  %v3542_v33 = vunpack.i.l.bf16 %v4666_v34 }
 0x310   :  { %3830 = vrot.lane.b32.xlu1 %v3724_v8, %s3967_s16 }
 0x311   :  { %3825 = vrot.lane.b32.xlu0 %v3724_v8, %s3968_s17  ;;  %v3528_v8 = vunpack.i.h.bf16 %v4662_v42 }
 0x312   :  { %v4675_v41 = vpop.permute.xlu1 %3550 }
 0x313   :  { %v4680_v56 = vpop.permute.xlu0 %3545 }
 0x314   :  { %1370 = vperm.xlu1 %3432, %v1360_v31  }
 0x315   :  { %1365 = vperm.xlu0 %3433, %v1359_v43  }
 0x316   :  { %v4685_v58 = vpop.permute.xlu1 %3560 }
 0x317   :  { %v4690_v25 = vpop.permute.xlu0 %3555  ;;  %v6217_v23 = vunpack.i.h.bf16 %v4685_v58  ;;  %v3562_v21 = vunpack.i.l.bf16 %v4685_v58 }
 0x318   :  { %1380 = vperm.xlu1 %3432, %v1362_v50   ;;  %v3558_v38 = vunpack.i.h.bf16 %v4690_v25  ;;  %v3557_v46 = vunpack.i.l.bf16 %v4690_v25 }
 0x319   :  { %1375 = vperm.xlu0 %3433, %v1361_v17  }
 0x31a   :  { %v4692_v44 = vpop.permute.xlu1 %3570  ;;  %v882_v1 = vsel %vm93_vm1, %v3517_v37, %v3557_v46  ;;  %v883_v48 = vsel %vm93_vm1, %v3557_v46, %v3558_v38 }
 0x31b   :  { %v4694_v51 = vpop.permute.xlu0 %3565 }
 0x31c   :  { %v6218_v31 = vunpack.i.h.bf16 %v4694_v51  ;;  %v3567_v43 = vunpack.i.l.bf16 %v4694_v51 }
 0x31e   :  { %v4696_v35 = vpop.permute.xlu1 %3580 }
 0x31f   :  { %v4698_v4 = vpop.permute.xlu0 %3575  ;;  %v3582_v29 = vunpack.i.l.bf16 %v4696_v35 }
 0x322   :  { %v4700_v57 = vpop.permute.xlu1 %3590 }
 0x323   :  { %v4702_v61 = vpop.permute.xlu0 %3585 }
 0x326   :  { %v4704_v11 = vpop.permute.xlu1 %3600 }
 0x327   :  { %v4706_v63 = vpop.permute.xlu0 %3595 }
 0x328   :  { %v3597_v42 = vunpack.i.l.bf16 %v4706_v63 }
 0x32a   :  { %v4708_v2 = vpop.permute.xlu1 %3610  ;;  %v884_v15 = vsel %vm93_vm1, %v3558_v38, %v3597_v42 }
 0x32b   :  { %v4710_v6 = vpop.permute.xlu0 %3605 }
 0x32e   :  { %v4714_v60 = vpop.permute.xlu1 %3630 }
 0x32f   :  { %v3633_v45 = vunpack.i.h.bf16 %v4714_v60  ;;  %v3632_v52 = vunpack.i.l.bf16 %v4714_v60  ;;  %v4718_v5 = vpop.permute.xlu0 %3615 }
 0x331   :  { %v889_v12 = vsel %vm93_vm1, %v3518_v55, %v3632_v52  ;;  %v890_v49 = vsel %vm93_vm1, %v3632_v52, %v3633_v45  ;;  %v6221_v55 = vunpack.i.h.bf16 %v4706_v63 }
 0x332   :  { %v3046_v24 = vpack.c.bf16 %v889_v12, %v882_v1  ;;  %v4726_v19 = vpop.permute.xlu1 %3640  ;;  %v3044_v54 = vpack.c.bf16 %v890_v49, %v883_v48  ;;  %v945_v12 = vsel %vm944_vm10, %v3522_v27, %v3562_v21  ;;  %v946_v49 = vsel %vm944_vm10, %v3562_v21, %v6217_v23 }
 0x333   :  { %v4728_v3 = vpop.permute.xlu0 %3620  ;;  %v6219_v50 = vunpack.i.h.bf16 %v4726_v19  ;;  %v3642_v17 = vunpack.i.l.bf16 %v4726_v19  ;;  %v1008_v27 = vsel %vm221_vm5, %v3567_v43, %v6218_v31  ;;  %v885_v52 = vsel %vm93_vm1, %v3597_v42, %v6221_v55 }
 0x334   :  { %3045 = vmatprep.subr.bf16.mxu0 %v3044_v54  ;;  %v3572_v54 = vunpack.i.l.bf16 %v4692_v44 }
 0x335   :  { %3047 = vmatpush1.bf16.msra.mxu0 %v3046_v24  ;;  %v6225_v24 = vunpack.i.h.bf16 %v4692_v44  ;;  %v1015_v21 = vsel %vm221_vm5, %v3642_v17, %v6219_v50 }
 0x336   :  { %v4732_v7 = vpop.permute.xlu1 %3650  ;;  %v1069_v60 = vsel %vm285_vm7, %v3532_v32, %v3572_v54  ;;  %v6256_v32 = vunpack.i.h.bf16 %v4696_v35 }
 0x337   :  { %v4738_v13 = vpop.permute.xlu0 %3625  ;;  %v3652_v42 = vunpack.i.l.bf16 %v4732_v7 }
 0x33a   :  { %v4752_v37 = vpop.permute.xlu1 %3660 }
 0x33b   :  { %v4757_v48 = vpop.permute.xlu0 %3635 }
 0x33c   :  { %v6220_v10 = vunpack.i.h.bf16 %v4757_v48  ;;  %v3637_v16 = vunpack.i.l.bf16 %v4757_v48 }
 0x33e   :  { %v952_v1 = vsel %vm944_vm10, %v3523_v26, %v3637_v16  ;;  %v4776_v40 = vpop.permute.xlu1 %3670  ;;  %v953_v23 = vsel %vm944_vm10, %v3637_v16, %v6220_v10  ;;  %v1014_v26 = vsel %vm221_vm5, %v3528_v8, %v3642_v17  ;;  %v3052_v16 = vpack.c.bf16 %v1015_v21, %v1008_v27 }
 0x33f   :  { %v3050_v31 = vpack.c.bf16 %v952_v1, %v945_v12  ;;  %v6222_v25 = vunpack.i.h.bf16 %v4776_v40  ;;  %v3672_v50 = vunpack.i.l.bf16 %v4776_v40  ;;  %v4786_v46 = vpop.permute.xlu0 %3645  ;;  %v3048_v38 = vpack.c.bf16 %v953_v23, %v946_v49 }
 0x340   :  { %v6224_v62 = vunpack.i.h.bf16 %v4786_v46  ;;  %v3647_v53 = vunpack.i.l.bf16 %v4786_v46  ;;  %v6223_v10 = vunpack.i.h.bf16 %v4732_v7  ;;  %v6226_v21 = vunpack.i.h.bf16 %v4698_v4 }
 0x341   :  { %v891_v1 = vsel %vm93_vm1, %v3633_v45, %v3672_v50  ;;  %3049 = vmatprep.subr.bf16.mxu0 %v3048_v38  ;;  %v892_v23 = vsel %vm93_vm1, %v3672_v50, %v6222_v25  ;;  %v1007_v45 = vsel %vm221_vm5, %v3527_v30, %v3567_v43  ;;  %v3577_v38 = vunpack.i.l.bf16 %v4698_v4 }
 0x342   :  { %v3082_v17 = vpack.c.bf16 %v891_v1, %v884_v15  ;;  %3051 = vmatpush1.bf16.msra.mxu0 %v3050_v31  ;;  %v4800_v12 = vpop.permute.xlu1 %3685  ;;  %v3080_v49 = vpack.c.bf16 %v892_v23, %v885_v52  ;;  %v1077_v27 = vsel %vm285_vm7, %v3647_v53, %v6224_v62  ;;  %v4812_v15 = vsel %vm1194_vm11, %v3542_v33, %v3582_v29 }
 0x343   :  { %v4809_v50 = vpop.permute.xlu0 %3655  ;;  %3053 = vmatprep.subr.bf16.mxu0 %v3052_v16  ;;  %v3054_v31 = vpack.c.bf16 %v1014_v26, %v1007_v45  ;;  %v1070_v52 = vsel %vm285_vm7, %v3572_v54, %v6225_v24  ;;  %v1196_v30 = vsel %vm1194_vm11, %v3582_v29, %v6256_v32  ;;  %v6228_v43 = vunpack.i.h.bf16 %v4700_v57 }
 0x344   :  { %3081 = vmatprep.subr.bf16.mxu1 %v3080_v49  ;;  %v6257_v1 = vunpack.i.h.bf16 %v4660_v39  ;;  %v3056_v33 = vpack.c.bf16 %v1077_v27, %v1070_v52  ;;  %v1140_v26 = vsel %vm1131_vm12, %v3652_v42, %v6223_v10  ;;  %v3592_v23 = vunpack.i.l.bf16 %v4700_v57 }
 0x345   :  { %3083 = vmatpush1.bf16.msra.mxu1 %v3082_v17  ;;  %v3602_v54 = vunpack.i.l.bf16 %v4704_v11  ;;  %v6227_v49 = vunpack.i.h.bf16 %v4809_v50  ;;  %v3657_v29 = vunpack.i.l.bf16 %v4809_v50  ;;  %v6258_v39 = vunpack.i.l.bf16 %v4668_v36 }
 0x346   :  { %v1076_v16 = vsel %vm285_vm7, %v6257_v1, %v3647_v53  ;;  %3055 = vmatpush1.bf16.msra.mxu0 %v3054_v31  ;;  %v4831_v45 = vpop.permute.xlu1 %3720  ;;  %v6229_v27 = vunpack.i.h.bf16 %v4704_v11  ;;  %v1133_v32 = vsel %vm1131_vm12, %v3577_v38, %v6226_v21  ;;  %v3587_v1 = vunpack.i.l.bf16 %v4702_v61 }
 0x347   :  { %v1132_v53 = vsel %vm1131_vm12, %v6258_v39, %v3577_v38  ;;  %v4838_v52 = vpop.permute.xlu0 %3665  ;;  %3057 = vmatprep.subr.bf16.mxu0 %v3056_v33  ;;  %v6259_v31 = vunpack.i.h.bf16 %v4668_v36  ;;  %v3058_v25 = vpack.c.bf16 %v1076_v16, %v1069_v60  ;;  %v3060_v10 = vpack.c.bf16 %v1140_v26, %v1133_v32 }
 0x348   :  { %v6231_v39 = vunpack.i.h.bf16 %v4752_v37  ;;  %v3662_v62 = vunpack.i.l.bf16 %v4752_v37  ;;  %v6230_v24 = vunpack.i.h.bf16 %v4800_v12  ;;  %v3687_v33 = vunpack.i.l.bf16 %v4800_v12 }
 0x349   :  { %v1139_v55 = vsel %vm1131_vm12, %v6259_v31, %v3652_v42  ;;  %v6260_v17 = vunpack.i.l.bf16 %v4675_v41  ;;  %v6261_v21 = vunpack.i.h.bf16 %v4685_v58  ;;  %v1203_v60 = vsel %vm1194_vm11, %v3657_v29, %v6227_v49 }
 0x34a   :  { %3059 = vmatpush1.bf16.msra.mxu0 %v3058_v25  ;;  %v4859_v42 = vpop.permute.xlu1 %3725  ;;  %v4867_v16 = vsel %vm1320_vm13, %v3592_v23, %v6228_v43  ;;  %v948_v25 = vsel %vm944_vm10, %v3602_v54, %v6229_v27  ;;  %v3062_v31 = vpack.c.bf16 %v1139_v55, %v1132_v53  ;;  %v6262_v43 = vunpack.i.h.bf16 %v4666_v34 }
 0x34b   :  { %v4854_v38 = vsel %vm1320_vm13, %v6260_v17, %v3592_v23  ;;  %v947_v36 = vsel %vm944_vm10, %v6261_v21, %v3602_v54  ;;  %v3612_v17 = vunpack.i.l.bf16 %v4708_v2  ;;  %v4872_v32 = vpop.permute.xlu0 %3675  ;;  %3061 = vmatprep.subr.bf16.mxu0 %v3060_v10  ;;  %v3607_v21 = vunpack.i.l.bf16 %v4710_v6 }
 0x34c   :  { %v6233_v49 = vunpack.i.h.bf16 %v4872_v32  ;;  %v3677_v23 = vunpack.i.l.bf16 %v4872_v32  ;;  %v1202_v26 = vsel %vm1194_vm11, %v6262_v43, %v3657_v29  ;;  %v3064_v8 = vpack.c.bf16 %v1203_v60, %v1196_v30 }
 0x34d   :  { %v1266_v10 = vsel %vm1257_vm14, %v3662_v62, %v6231_v39  ;;  %v1017_v54 = vsel %vm221_vm5, %v3687_v33, %v6230_v24  ;;  %v3667_v55 = vunpack.i.l.bf16 %v4838_v52  ;;  %v6263_v53 = vunpack.i.h.bf16 %v4757_v48 }
 0x34e   :  { %3063 = vmatpush1.bf16.msra.mxu0 %v3062_v31  ;;  %v4894_v34 = vpop.permute.xlu1 %3735  ;;  %v955_v30 = vsel %vm944_vm10, %v3677_v23, %v6233_v49  ;;  %v6264_v43 = vunpack.i.l.bf16 %v4680_v56  ;;  %v6265_v48 = vunpack.i.h.bf16 %v4702_v61  ;;  %v6266_v31 = vunpack.i.h.bf16 %v4680_v56 }
 0x34f   :  { %v954_v58 = vsel %vm944_vm10, %v6263_v53, %v3677_v23  ;;  %v4902_v24 = vpop.permute.xlu0 %3680  ;;  %3065 = vmatprep.subr.bf16.mxu0 %v3064_v8  ;;  %v3084_v39 = vpack.c.bf16 %v955_v30, %v948_v25  ;;  %v3066_v20 = vpack.c.bf16 %v1202_v26, %v4812_v15  ;;  %v6267_v49 = vunpack.i.h.bf16 %v4710_v6 }
 0x350   :  { %v1258_v29 = vsel %vm1257_vm14, %v6264_v43, %v3587_v1  ;;  %v3086_v60 = vpack.c.bf16 %v954_v58, %v947_v36  ;;  %v1259_v53 = vsel %vm1257_vm14, %v3587_v1, %v6265_v48  ;;  %v1265_v27 = vsel %vm1257_vm14, %v6266_v31, %v3662_v62 }
 0x351   :  { %v3068_v23 = vpack.c.bf16 %v1266_v10, %v1259_v53  ;;  %v1010_v43 = vsel %vm221_vm5, %v3607_v21, %v6267_v49  ;;  %v6268_v36 = vunpack.i.h.bf16 %v4726_v19  ;;  %v3738_v58 = vunpack.i.h.bf16 %v4894_v34  ;;  %3085 = vmatprep.subr.bf16.mxu1 %v3084_v39 }
 0x352   :  { %v3737_v25 = vunpack.i.l.bf16 %v4894_v34  ;;  %v3088_v1 = vpack.c.bf16 %v1017_v54, %v1010_v43  ;;  %v3553_v56 = vunpack.i.h.bf16 %v4675_v41  ;;  %v6269_v62 = vunpack.i.h.bf16 %v4692_v44  ;;  %3067 = vmatpush1.bf16.msra.mxu0 %v3066_v20  ;;  %3087 = vmatpush1.bf16.msra.mxu1 %v3086_v60  ;;  %v4923_v26 = vpop.permute.xlu1 %3740 }
 0x353   :  { %v1016_v8 = vsel %vm221_vm5, %v6268_v36, %v3687_v33  ;;  %v6270_v19 = vunpack.i.h.bf16 %v4838_v52  ;;  %v6271_v33 = vunpack.i.h.bf16 %v4708_v2  ;;  %v6272_v39 = vunpack.i.h.bf16 %v4694_v51  ;;  %v4937_v30 = vpop.permute.xlu0 %3690  ;;  %3069 = vmatprep.subr.bf16.mxu0 %v3068_v23 }
 0x354   :  { %v1071_v15 = vsel %vm285_vm7, %v6269_v62, %v3612_v17  ;;  %v3618_v44 = vunpack.i.h.bf16 %v4718_v5  ;;  %v3617_v54 = vunpack.i.l.bf16 %v4718_v5  ;;  %v3623_v20 = vunpack.i.h.bf16 %v4728_v3  ;;  %3089 = vmatprep.subr.bf16.mxu1 %v3088_v1 }
 0x355   :  { %v1329_v49 = vsel %vm1320_vm13, %v3667_v55, %v6270_v19  ;;  %v1072_v10 = vsel %vm285_vm7, %v3612_v17, %v6271_v33  ;;  %v1009_v41 = vsel %vm221_vm5, %v6272_v39, %v3607_v21  ;;  %v3070_v60 = vpack.c.bf16 %v1265_v27, %v1258_v29 }
 0x356   :  { %v3090_v48 = vpack.c.bf16 %v1016_v8, %v1009_v41  ;;  %v3693_v53 = vunpack.i.h.bf16 %v4937_v30  ;;  %v3692_v17 = vunpack.i.l.bf16 %v4937_v30  ;;  %v3622_v51 = vunpack.i.l.bf16 %v4728_v3  ;;  %v4952_v8 = vpop.permute.xlu1 %3745 }
 0x357   :  { %v1328_v21 = vsel %vm1320_vm13, %v3553_v56, %v3667_v55  ;;  %v3072_v31 = vpack.c.bf16 %v1329_v49, %v4867_v16  ;;  %v1142_v43 = vsel %vm1131_vm12, %v3737_v25, %v3738_v58  ;;  %v3743_v36 = vunpack.i.h.bf16 %v4923_v26  ;;  %3071 = vmatpush1.bf16.msra.mxu0 %v3070_v60  ;;  %v4959_v62 = vpop.permute.xlu0 %3695 }
 0x358   :  { %v3742_v23 = vunpack.i.l.bf16 %v4923_v26  ;;  %v6273_v27 = vunpack.i.h.bf16 %v4786_v46  ;;  %3091 = vmatpush1.bf16.msra.mxu1 %v3090_v48  ;;  %v1079_v16 = vsel %vm285_vm7, %v3692_v17, %v3693_v53  ;;  %v3748_v1 = vunpack.i.h.bf16 %v4952_v8 }
 0x359   :  { %v3747_v56 = vunpack.i.l.bf16 %v4952_v8  ;;  %3073 = vmatprep.subr.bf16.mxu0 %v3072_v31  ;;  %v3092_v19 = vpack.c.bf16 %v1079_v16, %v1072_v10  ;;  %v3628_v46 = vunpack.i.h.bf16 %v4738_v13  ;;  %v3627_v49 = vunpack.i.l.bf16 %v4738_v13 }
 0x35a   :  { %v1078_v29 = vsel %vm285_vm7, %v6273_v27, %v3692_v17  ;;  %v3074_v33 = vpack.c.bf16 %v1328_v21, %v4854_v38  ;;  %v1135_v39 = vsel %vm1131_vm12, %v3617_v54, %v3618_v44  ;;  %v6275_v60 = vunpack.i.h.bf16 %v4732_v7  ;;  %v4973_v17 = vpop.permute.xlu1 %3750  ;;  %v4978_v38 = vld [vmem:[%s6210_s3] sm:$0xff] }
 0x35b   :  { %v3094_v55 = vpack.c.bf16 %v1078_v29, %v1071_v15  ;;  %v6274_v15 = vunpack.i.h.bf16 %v4698_v4  ;;  %3093 = vmatprep.subr.bf16.mxu1 %v3092_v19  ;;  %v3096_v10 = vpack.c.bf16 %v1142_v43, %v1135_v39  ;;  %v1198_v4 = vsel %vm1194_vm11, %v3622_v51, %v3623_v20  ;;  %v4993_v27 = vpop.permute.xlu0 %3700 }
 0x35c   :  { %v1141_v48 = vsel %vm1131_vm12, %v6275_v60, %v3737_v25  ;;  %3075 = vmatpush1.bf16.msra.mxu0 %v3074_v33  ;;  %v1205_v7 = vsel %vm1194_vm11, %v3742_v23, %v3743_v36  ;;  %v894_v25 = vsel %vm93_vm1, %v3747_v56, %v3748_v1  ;;  %v3682_v21 = vunpack.i.l.bf16 %v4902_v24 }
 0x35d   :  { %v1134_v41 = vsel %vm1131_vm12, %v6274_v15, %v3617_v54  ;;  %3095 = vmatpush1.bf16.msra.mxu1 %v3094_v55  ;;  %v3683_v54 = vunpack.i.h.bf16 %v4902_v24  ;;  %v3753_v31 = vunpack.i.h.bf16 %v4973_v17  ;;  %v3752_v43 = vunpack.i.l.bf16 %v4973_v17 }
 0x35e   :  { %3097 = vmatprep.subr.bf16.mxu1 %v3096_v10  ;;  %v6276_v29 = vpack.c.bf16 %v4561_v18, %v4547_v9  ;;  %v3098_v16 = vpack.c.bf16 %v1141_v48, %v1134_v41  ;;  %v6277_v55 = vunpack.i.h.bf16 %v4809_v50  ;;  %v3697_v33 = vunpack.i.l.bf16 %v4959_v62  ;;  %v5012_v18 = vld [vmem:[%s6210_s3 + $0x18] sm:$0xff] }
 0x35f   :  { %v887_v39 = vsel %vm93_vm1, %v3627_v49, %v3628_v46  ;;  %v6278_v15 = vunpack.i.h.bf16 %v4776_v40  ;;  %1461 = vmatmul.mubr.f32.vlgmr.msra.gmra.mrb[8].mxu0 %v4978_v38  ;;  %v3100_v10 = vpack.c.bf16 %v1205_v7, %v1198_v4  ;;  %v6279_v50 = vunpack.i.h.bf16 %v4696_v35  ;;  %v5024_v4 = vpop.permute.xlu1 %3755  ;;  %v5029_v7 = vld [vmem:[%s6210_s3 + $0x10] sm:$0xff] }
 0x360   :  { %3113 = vmatprep.subr.bf16.mxu0 %v6276_v29  ;;  %v1204_v19 = vsel %vm1194_vm11, %v6277_v55, %v3742_v23  ;;  %v3116_v9 = vpack.c.bf16 %v894_v25, %v887_v39  ;;  %v6280_v41 = vunpack.i.h.bf16 %v4706_v63  ;;  %v3698_v40 = vunpack.i.h.bf16 %v4959_v62  ;;  %v5036_v25 = vpop.permute.xlu0 %3705  ;;  %2757 = vmatprep.mubr.msk.f32.mxu0 %vm1383_vm9, %v5012_v18  ;;  %v5051_v39 = vld [vmem:[%s6210_s3 + $0x28] sm:$0xff] }
 0x361   :  { %v893_v60 = vsel %vm93_vm1, %v6278_v15, %v3747_v56  ;;  %v1197_v23 = vsel %vm1194_vm11, %v6279_v50, %v3622_v51  ;;  %3099 = vmatpush1.bf16.msra.mxu1 %v3098_v16  ;;  %v6281_v56 = vpack.c.bf16 %v4555_v14, %v4568_v0  ;;  %v1268_v35 = vsel %vm1257_vm14, %v3752_v43, %v3753_v31 }
 0x362   :  { %v886_v48 = vsel %vm93_vm1, %v6280_v41, %v3627_v49  ;;  %v3102_v63 = vpack.c.bf16 %v1204_v19, %v1197_v23  ;;  %v3758_v51 = vunpack.i.h.bf16 %v5024_v4  ;;  %v3757_v49 = vunpack.i.l.bf16 %v5024_v4  ;;  %3101 = vmatprep.subr.bf16.mxu1 %v3100_v10 }
 0x363   :  { %3115 = vmatpush1.bf16.msra.mxu0 %v6281_v56  ;;  %v1261_v14 = vsel %vm1257_vm14, %v3682_v21, %v3683_v54  ;;  %v3118_v0 = vpack.c.bf16 %v893_v60, %v886_v48  ;;  %v6282_v29 = vunpack.i.h.bf16 %v4704_v11  ;;  %v6234_v55 = vunpack.i.h.bf16 %v4993_v27  ;;  %v5063_v41 = vpop.permute.xlu1 %3760 }
 0x364   :  { %3117 = vmatprep.subr.bf16.mxu0 %v3116_v9  ;;  %v3702_v19 = vunpack.i.l.bf16 %v4993_v27  ;;  %v6283_v15 = vunpack.i.h.bf16 %v4752_v37  ;;  %v6284_v11 = vunpack.i.h.bf16 %v4872_v32  ;;  %1467 = vmatmul.mubr.f32.gmra.mrb[10].mxu0 %v5029_v7  ;;  %v3104_v9 = vpack.c.bf16 %v1268_v35, %v1261_v14  ;;  %v5068_v37 = vld [vmem:[%s6210_s3 + $0x20] sm:$0xff] }
 0x365   :  { %v949_v16 = vsel %vm944_vm10, %v6282_v29, %v3697_v33  ;;  %v957_v50 = vsel %vm944_vm10, %v3757_v49, %v3758_v51  ;;  %3103 = vmatpush1.bf16.msra.mxu1 %v3102_v63  ;;  %v950_v32 = vsel %vm944_vm10, %v3697_v33, %v3698_v40  ;;  %v3763_v56 = vunpack.i.h.bf16 %v5063_v41  ;;  %v5078_v63 = vpop.permute.xlu0 %3710  ;;  %2758 = vmatprep.mubr.msk.f32.mxu0 %vm1383_vm9, %v5051_v39 }
 0x366   :  { %v1267_v60 = vsel %vm1257_vm14, %v6283_v15, %v3752_v43  ;;  %v956_v10 = vsel %vm944_vm10, %v6284_v11, %v3757_v49  ;;  %v6285_v43 = vunpack.i.h.bf16 %v4702_v61  ;;  %v3762_v35 = vunpack.i.l.bf16 %v5063_v41  ;;  %3105 = vmatprep.subr.bf16.mxu1 %v3104_v9  ;;  %v5088_v61 = vld [vmem:[%s6210_s3 + $0x38] sm:$0xff] }
 0x367   :  { %v3122_v23 = vpack.c.bf16 %v956_v10, %v949_v16  ;;  %3119 = vmatpush1.bf16.msra.mxu0 %v3118_v0  ;;  %v3120_v49 = vpack.c.bf16 %v957_v50, %v950_v32  ;;  %v6286_v0 = vunpack.i.h.bf16 %v4700_v57  ;;  %v6287_v29 = vunpack.i.h.bf16 %v4838_v52  ;;  %v5102_v10 = vpop.permute.xlu1 %3765  ;;  %v5107_v52 = vld [vmem:[%s6210_s3 + $0x30] sm:$0xff] }
 0x368   :  { %v1260_v48 = vsel %vm1257_vm14, %v6285_v43, %v3682_v21  ;;  %v3707_v21 = vunpack.i.l.bf16 %v5036_v25  ;;  %1473 = vmatmul.mubr.f32.gmra.mrb[12].mxu0 %v5068_v37  ;;  %v1324_v57 = vsel %vm1320_vm13, %v3702_v19, %v6234_v55  ;;  %v1331_v15 = vsel %vm1320_vm13, %v3762_v35, %v3763_v56 }
 0x369   :  { %v3106_v14 = vpack.c.bf16 %v1267_v60, %v1260_v48  ;;  %v1323_v33 = vsel %vm1320_vm13, %v6286_v0, %v3702_v19  ;;  %v1330_v16 = vsel %vm1320_vm13, %v6287_v29, %v3762_v35  ;;  %3121 = vmatprep.subr.bf16.mxu0 %v3120_v49  ;;  %v3708_v60 = vunpack.i.h.bf16 %v5036_v25  ;;  %v3716_v32 = vpop.permute.xlu0 %3715  ;;  %2759 = vmatprep.mubr.msk.f32.mxu0 %vm1383_vm9, %v5088_v61 }
 0x36a   :  { %v3110_v11 = vpack.c.bf16 %v1330_v16, %v1323_v33  ;;  %v3108_v9 = vpack.c.bf16 %v1331_v15, %v1324_v57  ;;  %v3768_v50 = vunpack.i.h.bf16 %v5102_v10  ;;  %v3767_v19 = vunpack.i.l.bf16 %v5102_v10 }
 0x36b   :  { %3107 = vmatpush1.bf16.msra.mxu1 %v3106_v14  ;;  %3123 = vmatpush1.bf16.msra.mxu0 %v3122_v23  ;;  %v3713_v43 = vunpack.i.h.bf16 %v5078_v63  ;;  %v3712_v23 = vunpack.i.l.bf16 %v5078_v63  ;;  %v3718_v48 = vunpack.i.h.bf16 %v3716_v32  ;;  %v3717_v35 = vunpack.i.l.bf16 %v3716_v32 }
 0x36c   :  { %3109 = vmatprep.subr.bf16.mxu1 %v3108_v9  ;;  %v6288_v49 = vunpack.i.h.bf16 %v4710_v6  ;;  %v6289_v0 = vunpack.i.h.bf16 %v4800_v12  ;;  %1479 = vmatmul.mubr.f32.gmra.mrb[14].mxu0 %v5107_v52  ;;  %v1019_v29 = vsel %vm221_vm5, %v3767_v19, %v3768_v50  ;;  %v3723_v16 = vunpack.i.h.bf16 %v4831_v45  ;;  %v5127_v9 = vpop.permute.xlu1 %3770 }
 0x36d   :  { %v3722_v57 = vunpack.i.l.bf16 %v4831_v45  ;;  %v1012_v6 = vsel %vm221_vm5, %v3707_v21, %v3708_v60  ;;  %v3728_v12 = vunpack.i.h.bf16 %v4859_v42  ;;  %v3773_v32 = vunpack.i.h.bf16 %v5127_v9  ;;  %2764 = vmatprep.mubr.msk.f32.mxu0 %vm1383_vm9, %v4622_v47 }
 0x36e   :  { %v1011_v14 = vsel %vm221_vm5, %v6288_v49, %v3707_v21  ;;  %v1018_v33 = vsel %vm221_vm5, %v6289_v0, %v3767_v19  ;;  %v3772_v49 = vunpack.i.l.bf16 %v5127_v9  ;;  %v5135_v0 = vpop.permute.xlu0 %3730  ;;  %v6290_v19 = vpack.c.bf16 %v4558_v59, %v4571_v22 }
 0x36f   :  { %v3126_v15 = vpack.c.bf16 %v1018_v33, %v1011_v14  ;;  %3111 = vmatpush1.bf16.msra.mxu1 %v3110_v11  ;;  %v3124_v14 = vpack.c.bf16 %v1019_v29, %v1012_v6  ;;  %v6291_v11 = vunpack.i.h.bf16 %v4708_v2  ;;  %v895_v33 = vsel %vm93_vm1, %v3748_v1, %v3718_v48 }
 0x370   :  { %3149 = vmatprep.subr.bf16.mxu1 %v6290_v19  ;;  %v888_v55 = vsel %vm93_vm1, %v3628_v46, %v3717_v35  ;;  %v1074_v59 = vsel %vm285_vm7, %v3712_v23, %v3713_v43  ;;  %v3727_v22 = vunpack.i.l.bf16 %v4859_v42  ;;  %v3152_v29 = vpack.c.bf16 %v3718_v48, %v3717_v35  ;;  %v6292_v42 = vld [vmem:[#allocation2_spill] sm:$0xff] }
 0x371   :  { %v1073_v21 = vsel %vm285_vm7, %v6291_v11, %v3712_v23  ;;  %v1080_v2 = vsel %vm285_vm7, %v3693_v53, %v3772_v49  ;;  %3125 = vmatprep.subr.bf16.mxu0 %v3124_v14  ;;  %v1081_v13 = vsel %vm285_vm7, %v3772_v49, %v3773_v32  ;;  %v958_v8 = vsel %vm944_vm10, %v3758_v51, %v3728_v12  ;;  %v5169_v53 = vpop.permute.xlu1 %3785 }
 0x372   :  { %1550 = vmatmul.mubr.f32.vlgmr.msra.gmra.mrb[8].mxu1 %v4978_v38  ;;  %v3130_v1 = vpack.c.bf16 %v1080_v2, %v1073_v21  ;;  %v3732_v46 = vunpack.i.l.bf16 %v5135_v0  ;;  %3127 = vmatpush1.bf16.msra.mxu0 %v3126_v15  ;;  %v6293_v30 = vpack.c.bf16 %v4564_v28, %v6292_v42  ;;  %v3128_v23 = vpack.c.bf16 %v1081_v13, %v1074_v59  ;;  %v5174_v35 = vpop.permute.xlu0 %3775 }
 0x373   :  { %v1136_v48 = vsel %vm1131_vm12, %v3618_v44, %v3722_v57  ;;  %2761 = vmatprep.mubr.msk.f32.mxu1 %vm1383_vm9, %v5012_v18  ;;  %v951_v4 = vsel %vm944_vm10, %v3698_v40, %v3727_v22  ;;  %v3154_v51 = vpack.c.bf16 %v895_v33, %v888_v55  ;;  %v3778_v28 = vunpack.i.h.bf16 %v5174_v35 }
 0x374   :  { %3151 = vmatpush1.bf16.msra.mxu1 %v6293_v30  ;;  %v3777_v15 = vunpack.i.l.bf16 %v5174_v35  ;;  %3129 = vmatprep.subr.bf16.mxu0 %v3128_v23  ;;  %v3156_v6 = vpack.c.bf16 %v3728_v12, %v3727_v22  ;;  %v3158_v5 = vpack.c.bf16 %v958_v8, %v951_v4  ;;  %v3733_v44 = vunpack.i.h.bf16 %v5135_v0 }
 0x375   :  { %3153 = vmatprep.subr.bf16.mxu1 %v3152_v29  ;;  %v1137_v49 = vsel %vm1131_vm12, %v3722_v57, %v3723_v16  ;;  %v1199_v62 = vsel %vm1194_vm11, %v3623_v20, %v3732_v46  ;;  %v5194_v55 = vpop.permute.xlu1 %3790  ;;  %v3787_v20 = vunpack.i.l.bf16 %v5169_v53 }
 0x376   :  { %1556 = vmatmul.mubr.f32.gmra.mrb[10].mxu1 %v5029_v7  ;;  %v1143_v40 = vsel %vm1131_vm12, %v3738_v58, %v3777_v15  ;;  %3131 = vmatpush1.bf16.msra.mxu0 %v3130_v1  ;;  %v1144_v12 = vsel %vm1131_vm12, %v3777_v15, %v3778_v28  ;;  %v3793_v14 = vunpack.i.h.bf16 %v5194_v55  ;;  %v3792_v57 = vunpack.i.l.bf16 %v5194_v55  ;;  %v3781_v3 = vpop.permute.xlu0 %3780 }
 0x377   :  { %v3134_v19 = vpack.c.bf16 %v1143_v40, %v1136_v48  ;;  %2762 = vmatprep.mubr.msk.f32.mxu1 %vm1383_vm9, %v5051_v39  ;;  %v3132_v34 = vpack.c.bf16 %v1144_v12, %v1137_v49  ;;  %v3788_v58 = vunpack.i.h.bf16 %v5169_v53  ;;  %v3783_v11 = vunpack.i.h.bf16 %v3781_v3 }
 0x378   :  { %3155 = vmatpush1.bf16.msra.mxu1 %v3154_v51  ;;  %v3782_v21 = vunpack.i.l.bf16 %v3781_v3  ;;  %v1206_v33 = vsel %vm1194_vm11, %v3743_v36, %v3792_v57  ;;  %v1200_v59 = vsel %vm1194_vm11, %v3732_v46, %v3733_v44  ;;  %v1207_v22 = vsel %vm1194_vm11, %v3792_v57, %v3793_v14 }
 0x379   :  { %3157 = vmatprep.subr.bf16.mxu1 %v3156_v6  ;;  %3133 = vmatprep.subr.bf16.mxu0 %v3132_v34  ;;  %v3138_v29 = vpack.c.bf16 %v1206_v33, %v1199_v62  ;;  %v1020_v2 = vsel %vm221_vm5, %v3768_v50, %v3783_v11  ;;  %v3796_v13 = vpop.permute.xlu1 %3795  ;;  %v3136_v30 = vpack.c.bf16 %v1207_v22, %v1200_v59  ;;  %v6294_v62 = vunpack.i.h.bf16 %v4993_v27 }
 0x37a   :  { %1562 = vmatmul.mubr.f32.gmra.mrb[12].mxu1 %v5068_v37  ;;  %v1013_v26 = vsel %vm221_vm5, %v3708_v60, %v3782_v21  ;;  %v3160_v36 = vpack.c.bf16 %v3783_v11, %v3782_v21  ;;  %3135 = vmatpush1.bf16.msra.mxu0 %v3134_v19  ;;  %v3798_v1 = vunpack.i.h.bf16 %v3796_v13  ;;  %v3797_v46 = vunpack.i.l.bf16 %v3796_v13  ;;  %v5221_v42 = vpop.permute.xlu0 %3800 }
 0x37b   :  { %v3162_v8 = vpack.c.bf16 %v1020_v2, %v1013_v26  ;;  %2763 = vmatprep.mubr.msk.f32.mxu1 %vm1383_vm9, %v5088_v61  ;;  %v1262_v10 = vsel %vm1257_vm14, %v3683_v54, %v3787_v20  ;;  %v3803_v25 = vunpack.i.h.bf16 %v5221_v42  ;;  %v3802_v60 = vunpack.i.l.bf16 %v5221_v42  ;;  %3137 = vmatprep.subr.bf16.mxu0 %v3136_v30 }
 0x37c   :  { %3159 = vmatpush1.bf16.msra.mxu1 %v3158_v5  ;;  %v1263_v50 = vsel %vm1257_vm14, %v3787_v20, %v3788_v58  ;;  %v1075_v23 = vsel %vm285_vm7, %v3713_v43, %v3797_v46  ;;  %v1082_v48 = vsel %vm285_vm7, %v3773_v32, %v3798_v1  ;;  %v3164_v24 = vpack.c.bf16 %v3798_v1, %v3797_v46 }
 0x37d   :  { %3161 = vmatprep.subr.bf16.mxu1 %v3160_v36  ;;  %v3166_v54 = vpack.c.bf16 %v1082_v48, %v1075_v23  ;;  %v1269_v4 = vsel %vm1257_vm14, %v3753_v31, %v3802_v60  ;;  %v3811_v51 = vpop.permute.xlu1 %3810  ;;  %v1270_v15 = vsel %vm1257_vm14, %v3802_v60, %v3803_v25 }
 0x37e   :  { %1568 = vmatmul.mubr.f32.gmra.mrb[14].mxu1 %v5107_v52  ;;  %3139 = vmatpush1.bf16.msra.mxu0 %v3138_v29  ;;  %v3142_v63 = vpack.c.bf16 %v1269_v4, %v1262_v10  ;;  %v3813_v43 = vunpack.i.h.bf16 %v3811_v51  ;;  %v3812_v9 = vunpack.i.l.bf16 %v3811_v51  ;;  %v3806_v32 = vpop.permute.xlu0 %3805  ;;  %v3140_v6 = vpack.c.bf16 %v1270_v15, %v1263_v50 }
 0x37f   :  { %2768 = vmatprep.mubr.msk.f32.mxu1 %vm1383_vm9, %v4622_v47  ;;  %v3808_v5 = vunpack.i.h.bf16 %v3806_v32  ;;  %v3807_v49 = vunpack.i.l.bf16 %v3806_v32 }
 0x380   :  { %3163 = vmatpush1.bf16.msra.mxu1 %v3162_v8  ;;  %v1332_v17 = vsel %vm1320_vm13, %v3763_v56, %v3812_v9  ;;  %3141 = vmatprep.subr.bf16.mxu0 %v3140_v6  ;;  %v1333_v31 = vsel %vm1320_vm13, %v3812_v9, %v3813_v43 }
 0x381   :  { %3165 = vmatprep.subr.bf16.mxu1 %v3164_v24  ;;  %v1325_v47 = vsel %vm1320_vm13, %v6294_v62, %v3807_v49  ;;  %v3821_v40 = vpop.permute.xlu1 %3820  ;;  %v1326_v12 = vsel %vm1320_vm13, %v3807_v49, %v3808_v5 }
 0x382   :  { %3143 = vmatpush1.bf16.msra.mxu0 %v3142_v63  ;;  %v3146_v19 = vpack.c.bf16 %v1332_v17, %v1325_v47  ;;  %v3822_v57 = vunpack.i.l.bf16 %v3821_v40  ;;  %v3816_v3 = vpop.permute.xlu0 %3815  ;;  %v3144_v34 = vpack.c.bf16 %v1333_v31, %v1326_v12  ;;  %v3823_v20 = vunpack.i.h.bf16 %v3821_v40 }
 0x383   :  { %v3818_v41 = vunpack.i.h.bf16 %v3816_v3  ;;  %v3817_v11 = vunpack.i.l.bf16 %v3816_v3 }
 0x384   :  { %3167 = vmatpush1.bf16.msra.mxu1 %v3166_v54  ;;  %3145 = vmatprep.subr.bf16.mxu0 %v3144_v34  ;;  %v1201_v33 = vsel %vm1194_vm11, %v3733_v44, %v3822_v57  ;;  %v1208_v29 = vsel %vm1194_vm11, %v3793_v14, %v3823_v20  ;;  %v3172_v2 = vpack.c.bf16 %v3823_v20, %v3822_v57 }
 0x385   :  { %v1138_v56 = vsel %vm1131_vm12, %v3723_v16, %v3817_v11  ;;  %v1145_v27 = vsel %vm1131_vm12, %v3778_v28, %v3818_v41  ;;  %v3168_v21 = vpack.c.bf16 %v3818_v41, %v3817_v11  ;;  %v3831_v45 = vpop.permute.xlu1 %3830  ;;  %v3174_v35 = vpack.c.bf16 %v1208_v29, %v1201_v33 }
 0x386   :  { %3147 = vmatpush1.bf16.msra.mxu0 %v3146_v19  ;;  %v3170_v59 = vpack.c.bf16 %v1145_v27, %v1138_v56  ;;  %v3826_v22 = vpop.permute.xlu0 %3825  ;;  %v3833_v28 = vunpack.i.h.bf16 %v3831_v45  ;;  %v3832_v0 = vunpack.i.l.bf16 %v3831_v45 }
 0x387   :  { %v3828_v26 = vunpack.i.h.bf16 %v3826_v22  ;;  %v3827_v16 = vunpack.i.l.bf16 %v3826_v22  ;;  %3169 = vmatprep.subr.bf16.mxu1 %v3168_v21 }
 0x388   :  { %3171 = vmatpush1.bf16.msra.mxu1 %v3170_v59  ;;  %v1327_v13 = vsel %vm1320_vm13, %v3808_v5, %v3832_v0  ;;  %v1334_v8 = vsel %vm1320_vm13, %v3813_v43, %v3833_v28  ;;  %v3180_v1 = vpack.c.bf16 %v3833_v28, %v3832_v0 }
 0x389   :  { %1639 = vmatmul.mubr.f32.vlgmr.msra.gmra.mrb[16].mxu0 %v4978_v38  ;;  %3173 = vmatprep.subr.bf16.mxu1 %v3172_v2  ;;  %v1264_v44 = vsel %vm1257_vm14, %v3788_v58, %v3827_v16  ;;  %v1271_v55 = vsel %vm1257_vm14, %v3803_v25, %v3828_v26  ;;  %v3176_v14 = vpack.c.bf16 %v3828_v26, %v3827_v16 }
 0x38a   :  { %2765 = vmatprep.mubr.msk.f32.mxu0 %vm1383_vm9, %v5012_v18  ;;  %v3178_v36 = vpack.c.bf16 %v1271_v55, %v1264_v44  ;;  %v3182_v53 = vpack.c.bf16 %v1334_v8, %v1327_v13 }
 0x38c   :  { %3175 = vmatpush1.bf16.msra.mxu1 %v3174_v35 }
 0x38d   :  { %1645 = vmatmul.mubr.f32.gmra.mrb[18].mxu0 %v5029_v7  ;;  %3177 = vmatprep.subr.bf16.mxu1 %v3176_v14 }
 0x38e   :  { %2766 = vmatprep.mubr.msk.f32.mxu0 %vm1383_vm9, %v5051_v39 }
 0x390   :  { %3179 = vmatpush1.bf16.msra.mxu1 %v3178_v36 }
 0x391   :  { %1651 = vmatmul.mubr.f32.gmra.mrb[20].mxu0 %v5068_v37  ;;  %3181 = vmatprep.subr.bf16.mxu1 %v3180_v1 }
 0x392   :  { %2767 = vmatprep.mubr.msk.f32.mxu0 %vm1383_vm9, %v5088_v61 }
 0x393   :  { %v5305_v50 = vpop.permute.xlu1 %1370 }
 0x394   :  { %3183 = vmatpush1.bf16.msra.mxu1 %v3182_v53 }
 0x395   :  { %1657 = vmatmul.mubr.f32.gmra.mrb[22].mxu0 %v5107_v52 }
 0x397   :  { %1728 = vmatmul.mubr.f32.vlgmr.msra.gmra.mrb[16].mxu1 %v4978_v38  ;;  %v5352_v34 = vpop.permute.xlu1 %1380 }
 0x398   :  { %2769 = vmatprep.mubr.msk.f32.mxu1 %vm1383_vm9, %v5012_v18 }
 0x39b   :  { %1734 = vmatmul.mubr.f32.gmra.mrb[18].mxu1 %v5029_v7  ;;  %v5294_v7 = vpop.permute.xlu0 %1365 }
 0x39c   :  { %2770 = vmatprep.mubr.msk.f32.mxu1 %vm1383_vm9, %v5051_v39 }
 0x39f   :  { %1740 = vmatmul.mubr.f32.gmra.mrb[20].mxu1 %v5068_v37  ;;  %v5327_v6 = vpop.permute.xlu0 %1375 }
 0x3a0   :  { %2771 = vmatprep.mubr.msk.f32.mxu1 %vm1383_vm9, %v5088_v61 }
 0x3a3   :  { %1746 = vmatmul.mubr.f32.gmra.mrb[22].mxu1 %v5107_v52 }
 0x432   :  { %v1462_v58 = vpop.f32.mrb[8].mxu0 }
 0x433   :  { %v1464_v46 = vpop.f32.mrb[9].mxu0  ;;  %v5300_v37 = vadd.f32 %v1462_v58, %v5294_v7 }
 0x434   :  { %v5297_v39 = vadd.f32 %v1464_v46, %v5294_v7 }
 0x435   :  { %v1752_v4 = vmax.f32 %v5300_v37, 0.0 }
 0x436   :  { %v1753_v48 = vmax.f32 %v5297_v39, 0.0  ;;  %v2199_v39 = vld [vmem:[%s6212_s7 + $0x138] sm:$0xff] }
 0x437   :  { %v1468_v42 = vpop.f32.mrb[10].mxu0 }
 0x438   :  { %v1470_v30 = vpop.f32.mrb[11].mxu0  ;;  %v5317_v51 = vadd.f32 %v1468_v42, %v5305_v50 }
 0x439   :  { %v5312_v24 = vadd.f32 %v1470_v30, %v5305_v50 }
 0x43a   :  { %v1760_v47 = vmax.f32 %v5317_v51, 0.0 }
 0x43b   :  { %v1474_v38 = vpop.f32.mrb[12].mxu0  ;;  %v1761_v17 = vmax.f32 %v5312_v24, 0.0 }
 0x43c   :  { %v1476_v10 = vpop.f32.mrb[13].mxu0  ;;  %v5391_v44 = vadd.f32 %v1474_v38, %v5327_v6 }
 0x43d   :  { %v5338_v31 = vadd.f32 %v1476_v10, %v5327_v6 }
 0x43e   :  { %v6252_v53 = vmax.f32 %v5391_v44, 0.0 }
 0x43f   :  { %v5292_v25 = vpop.f32.mrb[14].mxu0  ;;  %v6254_v41 = vmax.f32 %v5338_v31, 0.0 }
 0x440   :  { %v1482_v18 = vpop.f32.mrb[15].mxu0  ;;  %v5405_v58 = vadd.f32 %v5292_v25, %v5352_v34 }
 0x441   :  { %v5360_v11 = vadd.f32 %v1482_v18, %v5352_v34 }
 0x442   :  { %v6250_v10 = vmax.f32 %v5405_v58, 0.0 }
 0x443   :  { %v6251_v22 = vmax.f32 %v5360_v11, 0.0 }
 0x445   :  { %v1551_v61 = vpop.f32.mrb[8].mxu1 }
 0x446   :  { %v5303_v52 = vadd.f32 %v1551_v61, %v5294_v7  ;;  %v1553_v60 = vpop.f32.mrb[9].mxu1 }
 0x447   :  { %v5308_v23 = vadd.f32 %v1553_v60, %v5294_v7 }
 0x448   :  { %v1754_v54 = vmax.f32 %v5303_v52, 0.0  ;;  %v2169_v52 = vld [vmem:[%s6212_s7 + $0x48] sm:$0xff] }
 0x449   :  { %v1755_v15 = vmax.f32 %v5308_v23, 0.0  ;;  %v1557_v63 = vpop.f32.mrb[10].mxu1 }
 0x44a   :  { %v3834_v43 = vpack.i.bf16 %v1754_v54, %v1753_v48  ;;  %v5325_v9 = vadd.f32 %v1557_v63, %v5305_v50  ;;  %v1559_v32 = vpop.f32.mrb[11].mxu1 }
 0x44b   :  { %v3839_v5 = vpack.i.bf16 %v1752_v4, %v1755_v15  ;;  %v5334_v49 = vadd.f32 %v1559_v32, %v5305_v50 }
 0x44c   :  { %v1762_v62 = vmax.f32 %v5325_v9, 0.0  ;;  %3835 = vrot.lane.b32.xlu0 %v3834_v43, %s3954_s13 }
 0x44d   :  { %v6246_v40 = vmax.f32 %v5334_v49, 0.0  ;;  %v1563_v12 = vpop.f32.mrb[12].mxu1  ;;  %3840 = vrot.lane.b32.xlu1 %v3839_v5, %s3954_s13 }
 0x44e   :  { %v3844_v19 = vpack.i.bf16 %v1762_v62, %v1761_v17  ;;  %v5350_v57 = vadd.f32 %v1563_v12, %v5327_v6  ;;  %v1565_v3 = vpop.f32.mrb[13].mxu1 }
 0x44f   :  { %v3849_v20 = vpack.i.bf16 %v1760_v47, %v6246_v40  ;;  %v5384_v35 = vadd.f32 %v1565_v3, %v5327_v6 }
 0x450   :  { %v6253_v56 = vmax.f32 %v5350_v57, 0.0  ;;  %v6296_v9 = vmax.f32 %v5350_v57, 0.0  ;;  %v6297_v57 = vmax.f32 %v5391_v44, 0.0  ;;  %v6299_v44 = vmax.f32 %v5405_v58, 0.0 }
 0x451   :  { %v1569_v27 = vpop.f32.mrb[14].mxu1  ;;  %3850 = vrot.lane.b32.xlu0 %v3849_v20, %s3954_s13  ;;  %3845 = vrot.lane.b32.xlu1 %v3844_v19, %s3954_s13  ;;  %v6247_v13 = vmax.f32 %v5384_v35, 0.0 }
 0x452   :  { %v3854_v21 = vpack.i.bf16 %v6253_v56, %v6254_v41  ;;  %v5370_v33 = vadd.f32 %v1569_v27, %v5352_v34  ;;  %v1571_v59 = vpop.f32.mrb[15].mxu1 }
 0x453   :  { %v5396_v8 = vadd.f32 %v1571_v59, %v5352_v34  ;;  %v3864_v30 = vpack.i.bf16 %v6252_v53, %v6247_v13  ;;  %v2202_v53 = vld [vmem:[%s6212_s7 + $0x150] sm:$0xff] }
 0x454   :  { %v6249_v29 = vmax.f32 %v5370_v33, 0.0 }
 0x455   :  { %3855 = vrot.lane.b32.xlu1 %v3854_v21, %s3954_s13  ;;  %v6236_v38 = vmax.f32 %v5396_v8, 0.0 }
 0x456   :  { %v3869_v2 = vpack.i.bf16 %v6249_v29, %v6251_v22  ;;  %v2201_v29 = vld [vmem:[%s6212_s7 + $0x148] sm:$0xff] }
 0x457   :  { %v3874_v25 = vpack.i.bf16 %v6250_v10, %v6236_v38 }
 0x459   :  { %3870 = vrot.lane.b32.xlu1 %v3869_v2, %s3954_s13 }
 0x45c   :  { %v1640_v45 = vpop.f32.mrb[16].mxu0 }
 0x45d   :  { %v5381_v26 = vadd.f32 %v1640_v45, %v5294_v7  ;;  %v1642_v16 = vpop.f32.mrb[17].mxu0 }
 0x45e   :  { %v5387_v28 = vadd.f32 %v1642_v16, %v5294_v7 }
 0x45f   :  { %v1756_v0 = vmax.f32 %v5381_v26, 0.0 }
 0x460   :  { %v6248_v55 = vmax.f32 %v5387_v28, 0.0  ;;  %v1646_v14 = vpop.f32.mrb[18].mxu0 }
 0x461   :  { %v1648_v36 = vpop.f32.mrb[19].mxu0  ;;  %v5426_v43 = vadd.f32 %v1646_v14, %v5305_v50 }
 0x462   :  { %v3859_v1 = vpack.i.bf16 %v6248_v55, %v1756_v0  ;;  %v5429_v32 = vadd.f32 %v1648_v36, %v5305_v50 }
 0x463   :  { %v6245_v59 = vmax.f32 %v5426_v43, 0.0 }
 0x464   :  { %v1652_v46 = vpop.f32.mrb[20].mxu0  ;;  %3860 = vrot.lane.b32.xlu0 %v3859_v1, %s3954_s13  ;;  %v6243_v2 = vmax.f32 %v5429_v32, 0.0 }
 0x465   :  { %v1654_v42 = vpop.f32.mrb[21].mxu0  ;;  %v5420_v60 = vadd.f32 %v1652_v46, %v5327_v6 }
 0x466   :  { %v5423_v63 = vadd.f32 %v1654_v42, %v5327_v6  ;;  %v3879_v1 = vpack.i.bf16 %v6243_v2, %v6245_v59  ;;  %v2213_v59 = vld [vmem:[%s6212_s7 + $0x1a8] sm:$0xff] }
 0x467   :  { %v6244_v20 = vmax.f32 %v5420_v60, 0.0 }
 0x468   :  { %v1658_v18 = vpop.f32.mrb[22].mxu0  ;;  %3865 = vrot.lane.b32.xlu0 %v3864_v30, %s3954_s13  ;;  %v6235_v27 = vmax.f32 %v5423_v63, 0.0 }
 0x469   :  { %v1660_v61 = vpop.f32.mrb[23].mxu0  ;;  %v5460_v46 = vadd.f32 %v1658_v18, %v5352_v34 }
 0x46a   :  { %v1729_v5 = vpop.f32.mrb[16].mxu1  ;;  %v5463_v42 = vadd.f32 %v1660_v61, %v5352_v34 }
 0x46b   :  { %v1730_v12 = vadd.f32 %v1729_v5, %v5294_v7  ;;  %v1731_v19 = vpop.f32.mrb[17].mxu1 }
 0x46c   :  { %3875 = vrot.lane.b32.xlu0 %v3874_v25, %s3954_s13  ;;  %v5434_v3 = vadd.f32 %v1731_v19, %v5294_v7  ;;  %v3884_v7 = vpack.i.bf16 %v6235_v27, %v6244_v20  ;;  %v6239_v18 = vmax.f32 %v5463_v42, 0.0  ;;  %v2212_v20 = vld [vmem:[%s6212_s7 + $0x1a0] sm:$0xff] }
 0x46d   :  { %v5438_v21 = vmax.f32 %v1730_v12, 0.0 }
 0x46e   :  { %v6242_v45 = vmax.f32 %v5434_v3, 0.0  ;;  %v1735_v16 = vpop.f32.mrb[18].mxu1 }
 0x46f   :  { %v1737_v14 = vpop.f32.mrb[19].mxu1  ;;  %v1736_v30 = vadd.f32 %v1735_v16, %v5305_v50 }
 0x470   :  { %1824 = vrot.lane.b32.xlu0 %v5438_v21, %s3954_s13  ;;  %1952 = vrot.lane.b32.xlu1 %v6242_v45, %s3954_s13  ;;  %v5453_v36 = vadd.f32 %v1737_v14, %v5305_v50  ;;  %v6240_v14 = vmax.f32 %v5460_v46, 0.0  ;;  %v2181_v45 = vld [vmem:[%s6212_s7 + $0xa8] sm:$0xff] }
 0x471   :  { %v5472_v27 = vmax.f32 %v1736_v30, 0.0 }
 0x472   :  { %v1741_v25 = vpop.f32.mrb[20].mxu1  ;;  %v6238_v12 = vmax.f32 %v5453_v36, 0.0 }
 0x473   :  { %v1743_v5 = vpop.f32.mrb[21].mxu1  ;;  %v1742_v19 = vadd.f32 %v1741_v25, %v5327_v6 }
 0x474   :  { %3885 = vrot.lane.b32.xlu0 %v3884_v7, %s3954_s13  ;;  %3880 = vrot.lane.b32.xlu1 %v3879_v1, %s3954_s13  ;;  %v3889_v7 = vpack.i.bf16 %v6239_v18, %v6240_v14  ;;  %v5487_v1 = vadd.f32 %v1743_v5, %v5327_v6  ;;  %v2176_v5 = vld [vmem:[%s6212_s7 + $0x80] sm:$0xff] }
 0x475   :  { %v5479_v50 = vmax.f32 %v1742_v19, 0.0  ;;  %v2192_v14 = vld [vmem:[%s6212_s7 + $0x100] sm:$0xff] }
 0x476   :  { %v1747_v61 = vpop.f32.mrb[22].mxu1  ;;  %v6237_v25 = vmax.f32 %v5487_v1, 0.0 }
 0x477   :  { %v1749_v38 = vpop.f32.mrb[23].mxu1  ;;  %v1748_v16 = vadd.f32 %v1747_v61, %v5352_v34  ;;  %v2177_v61 = vld [vmem:[%s6212_s7 + $0x88] sm:$0xff] }
 0x478   :  { %1954 = vrot.lane.b32.xlu0 %v6238_v12, %s3954_s13  ;;  %1838 = vrot.lane.b32.xlu1 %v5472_v27, %s3954_s13  ;;  %v5496_v19 = vadd.f32 %v1749_v38, %v5352_v34  ;;  %v2160_v34 = vld [vmem:[%s6212_s7] sm:$0xff]  ;;  %v3184_v38 = vpack.c.bf16 %v2177_v61, %v2176_v5  ;;  %v2193_v5 = vld [vmem:[%s6212_s7 + $0x108] sm:$0xff] }
 0x479   :  { %v5492_v30 = vmax.f32 %v1748_v16, 0.0  ;;  %v2161_v16 = vld [vmem:[%s6212_s7 + $0x8] sm:$0xff]  ;;  %v3218_v61 = vpack.c.bf16 %v2193_v5, %v2192_v14  ;;  %v2163_v14 = vld [vmem:[%s6212_s7 + $0x18] sm:$0xff]  ;;  %v2194_v5 = vld [vmem:[%s6212_s7 + $0x110] sm:$0xff] }
 0x47a   :  { %v6241_v6 = vmax.f32 %v5496_v19, 0.0  ;;  %v3186_v12 = vpack.c.bf16 %v2161_v16, %v2160_v34  ;;  %3185 = vmatprep.subr.bf16.mxu0 %v3184_v38  ;;  %v2162_v34 = vld [vmem:[%s6212_s7 + $0x10] sm:$0xff] }
 0x47b   :  { %v3190_v38 = vpack.c.bf16 %v2163_v14, %v2162_v34  ;;  %v2164_v34 = vld [vmem:[%s6212_s7 + $0x20] sm:$0xff]  ;;  %v2165_v14 = vld [vmem:[%s6212_s7 + $0x28] sm:$0xff] }
 0x47c   :  { %1852 = vrot.lane.b32.xlu0 %v5479_v50, %s3954_s13  ;;  %3890 = vrot.lane.b32.xlu1 %v3889_v7, %s3954_s13  ;;  %v2208_v7 = vld [vmem:[%s6212_s7 + $0x180] sm:$0xff]  ;;  %v3194_v2 = vpack.c.bf16 %v2165_v14, %v2164_v34  ;;  %v2183_v34 = vld [vmem:[%s6212_s7 + $0xb8] sm:$0xff] }
 0x47d   :  { %3187 = vmatpush3.bf16.msra.mxu0 %v3186_v12  ;;  %v2210_v12 = vld [vmem:[%s6212_s7 + $0x190] sm:$0xff] }
 0x480   :  { %1866 = vrot.lane.b32.xlu0 %v5492_v30, %s3954_s13  ;;  %1956 = vrot.lane.b32.xlu1 %v6237_v25, %s3954_s13  ;;  %v2209_v25 = vld [vmem:[%s6212_s7 + $0x188] sm:$0xff] }
 0x481   :  { %v3216_v18 = vpack.c.bf16 %v2209_v25, %v2208_v7  ;;  %v2179_v25 = vld [vmem:[%s6212_s7 + $0x98] sm:$0xff] }
 0x483   :  { %3217 = vmatprep.subr.bf16.mxu1 %v3216_v18  ;;  %v2211_v18 = vld [vmem:[%s6212_s7 + $0x198] sm:$0xff] }
 0x484   :  { %1958 = vrot.lane.b32.xlu1 %v6241_v6, %s3954_s13  ;;  %3219 = vmatpush3.bf16.msra.mxu1 %v3218_v61  ;;  %v2178_v6 = vld [vmem:[%s6212_s7 + $0x90] sm:$0xff]  ;;  %v3220_v7 = vpack.c.bf16 %v2211_v18, %v2210_v12  ;;  %v2180_v61 = vld [vmem:[%s6212_s7 + $0xa0] sm:$0xff] }
 0x485   :  { %v3188_v16 = vpack.c.bf16 %v2179_v25, %v2178_v6  ;;  %v2195_v6 = vld [vmem:[%s6212_s7 + $0x118] sm:$0xff]  ;;  %v3192_v18 = vpack.c.bf16 %v2181_v45, %v2180_v61  ;;  %v2196_v45 = vld [vmem:[%s6212_s7 + $0x120] sm:$0xff]  ;;  %v2197_v61 = vld [vmem:[%s6212_s7 + $0x128] sm:$0xff] }
 0x486   :  { %v3222_v25 = vpack.c.bf16 %v2195_v6, %v2194_v5  ;;  %3221 = vmatprep.subr.bf16.mxu1 %v3220_v7  ;;  %v3224_v7 = vpack.c.bf16 %v2213_v59, %v2212_v20  ;;  %v3226_v40 = vpack.c.bf16 %v2197_v61, %v2196_v45  ;;  %v2166_v20 = vld [vmem:[%s6212_s7 + $0x30] sm:$0xff]  ;;  %v2167_v59 = vld [vmem:[%s6212_s7 + $0x38] sm:$0xff] }
 0x487   :  { %3189 = vmatprep.subr.bf16.mxu0 %v3188_v16  ;;  %v2215_v61 = vld [vmem:[%s6212_s7 + $0x1b8] sm:$0xff] }
 0x488   :  { %3191 = vmatpush3.bf16.msra.mxu0 %v3190_v38  ;;  %3223 = vmatpush3.bf16.msra.mxu1 %v3222_v25  ;;  %v2182_v25 = vld [vmem:[%s6212_s7 + $0xb0] sm:$0xff] }
 0x489   :  { %3193 = vmatprep.subr.bf16.mxu0 %v3192_v18  ;;  %v3196_v13 = vpack.c.bf16 %v2183_v34, %v2182_v25  ;;  %v2214_v18 = vld [vmem:[%s6212_s7 + $0x1b0] sm:$0xff]  ;;  %3225 = vmatprep.subr.bf16.mxu1 %v3224_v7  ;;  %v2185_v7 = vld [vmem:[%s6212_s7 + $0xc8] sm:$0xff]  ;;  %v2168_v34 = vld [vmem:[%s6212_s7 + $0x40] sm:$0xff] }
 0x48a   :  { %v2198_v25 = vld [vmem:[%s6212_s7 + $0x130] sm:$0xff]  ;;  %v3202_v10 = vpack.c.bf16 %v2169_v52, %v2168_v34  ;;  %v2188_v52 = vld [vmem:[%s6212_s7 + $0xe0] sm:$0xff] }
 0x48c   :  { %3195 = vmatpush3.bf16.msra.mxu0 %v3194_v2  ;;  %3227 = vmatpush3.bf16.msra.mxu1 %v3226_v40  ;;  %v3198_v2 = vpack.c.bf16 %v2167_v59, %v2166_v20  ;;  %v2217_v59 = vld [vmem:[%s6212_s7 + $0x1c8] sm:$0xff] }
 0x48d   :  { %3197 = vmatprep.subr.bf16.mxu0 %v3196_v13  ;;  %v3228_v13 = vpack.c.bf16 %v2215_v61, %v2214_v18  ;;  %v2186_v18 = vld [vmem:[%s6212_s7 + $0xd0] sm:$0xff]  ;;  %v2187_v61 = vld [vmem:[%s6212_s7 + $0xd8] sm:$0xff] }
 0x48f   :  { %3229 = vmatprep.subr.bf16.mxu1 %v3228_v13  ;;  %v3204_v13 = vpack.c.bf16 %v2187_v61, %v2186_v18 }
 0x490   :  { %3199 = vmatpush3.bf16.msra.mxu0 %v3198_v2  ;;  %v2218_v2 = vld [vmem:[%s6212_s7 + $0x1d0] sm:$0xff] }
 0x4be   :  { %v5567_v12 = vpop.permute.xlu0 %3835 }
 0x4bf   :  { %v3838_v16 = vunpack.i.h.bf16 %v5567_v12  ;;  %v3837_v5 = vunpack.i.l.bf16 %v5567_v12  ;;  %v5571_v6 = vpop.permute.xlu1 %3840 }
 0x4c0   :  { %v3842_v38 = vunpack.i.l.bf16 %v5571_v6 }
 0x4c1   :  { %v1869_v14 = vsel %vm93_vm1, %v3837_v5, %v3838_v16 }
 0x4c2   :  { %v5606_v55 = vmax.f32 %v1753_v48, %v1869_v14  ;;  %v1870_v45 = vsel %vm93_vm1, %v3838_v16, %v3842_v38  ;;  %v2184_v16 = vld [vmem:[%s6212_s7 + $0xc0] sm:$0xff]  ;;  %v3230_v14 = vpack.c.bf16 %v2199_v39, %v2198_v25  ;;  %v2170_v25 = vld [vmem:[%s6212_s7 + $0x50] sm:$0xff]  ;;  %v2171_v39 = vld [vmem:[%s6212_s7 + $0x58] sm:$0xff] }
 0x4c3   :  { %v5622_v48 = vmax.f32 %v1754_v54, %v1870_v45  ;;  %v2216_v54 = vld [vmem:[%s6212_s7 + $0x1c0] sm:$0xff]  ;;  %v3200_v20 = vpack.c.bf16 %v2185_v7, %v2184_v16  ;;  %v2219_v16 = vld [vmem:[%s6212_s7 + $0x1d8] sm:$0xff]  ;;  %v3846_v61 = vpop.permute.xlu1 %3845 }
 0x4c4   :  { %v2200_v45 = vld [vmem:[%s6212_s7 + $0x140] sm:$0xff]  ;;  %3231 = vmatpush3.bf16.msra.mxu1 %v3230_v14  ;;  %v3232_v7 = vpack.c.bf16 %v2217_v59, %v2216_v54  ;;  %v3236_v22 = vpack.c.bf16 %v2219_v16, %v2218_v2  ;;  %v2203_v14 = vld [vmem:[%s6212_s7 + $0x158] sm:$0xff]  ;;  %v2205_v2 = vld [vmem:[%s6212_s7 + $0x168] sm:$0xff] }
 0x4c5   :  { %v3894_v40 = vpack.i.bf16 %v5622_v48, %v5606_v55  ;;  %3201 = vmatprep.subr.bf16.mxu0 %v3200_v20  ;;  %v3234_v34 = vpack.c.bf16 %v2201_v29, %v2200_v45  ;;  %v3206_v29 = vpack.c.bf16 %v2171_v39, %v2170_v25  ;;  %v2220_v54 = vld [vmem:[%s6212_s7 + $0x1e0] sm:$0xff]  ;;  %v2221_v20 = vld [vmem:[%s6212_s7 + $0x1e8] sm:$0xff]  ;;  %v3238_v18 = vpack.c.bf16 %v2203_v14, %v2202_v53  ;;  %v5700_v53 = vpop.permute.xlu0 %3850  ;;  %v2191_v14 = vld [vmem:[%s6212_s7 + $0xf8] sm:$0xff] }
 0x4c6   :  { %3203 = vmatpush3.bf16.msra.mxu0 %v3202_v10  ;;  %3233 = vmatprep.subr.bf16.mxu1 %v3232_v7  ;;  %v2172_v45 = vld [vmem:[%s6212_s7 + $0x60] sm:$0xff]  ;;  %v2173_v10 = vld [vmem:[%s6212_s7 + $0x68] sm:$0xff]  ;;  %v3240_v25 = vpack.c.bf16 %v2221_v20, %v2220_v54  ;;  %v3853_v20 = vunpack.i.h.bf16 %v5700_v53 }
 0x4c7   :  { %3895 = vrot.lane.b32.xlu0 %v3894_v40, %s3960_s19  ;;  %v2189_v40 = vld [vmem:[%s6212_s7 + $0xe8] sm:$0xff]  ;;  %3205 = vmatprep.subr.bf16.mxu0 %v3204_v13  ;;  %v2204_v39 = vld [vmem:[%s6212_s7 + $0x160] sm:$0xff]  ;;  %v3210_v16 = vpack.c.bf16 %v2173_v10, %v2172_v45  ;;  %v2190_v13 = vld [vmem:[%s6212_s7 + $0xf0] sm:$0xff] }
 0x4c8   :  { %v3208_v59 = vpack.c.bf16 %v2189_v40, %v2188_v52  ;;  %3235 = vmatpush3.bf16.msra.mxu1 %v3234_v34  ;;  %v3242_v7 = vpack.c.bf16 %v2205_v2, %v2204_v39  ;;  %v3843_v34 = vunpack.i.h.bf16 %v5571_v6  ;;  %v3848_v52 = vunpack.i.h.bf16 %v3846_v61  ;;  %v2175_v10 = vld [vmem:[%s6212_s7 + $0x78] sm:$0xff] }
 0x4c9   :  { %3237 = vmatprep.subr.bf16.mxu1 %v3236_v22  ;;  %v3856_v22 = vpop.permute.xlu1 %3855  ;;  %v3847_v40 = vunpack.i.l.bf16 %v3846_v61  ;;  %v3212_v45 = vpack.c.bf16 %v2191_v14, %v2190_v13  ;;  %v2223_v61 = vld [vmem:[%s6212_s7 + $0x1f8] sm:$0xff] }
 0x4ca   :  { %3207 = vmatpush3.bf16.msra.mxu0 %v3206_v29  ;;  %v2174_v29 = vld [vmem:[%s6212_s7 + $0x70] sm:$0xff]  ;;  %v1868_v54 = vsel %vm93_vm1, %v3843_v34, %v3837_v5  ;;  %v3858_v12 = vunpack.i.h.bf16 %v3856_v22  ;;  %v2240_v34 = vld [vmem:[%s6212_s7 + $0x280] sm:$0xff] }
 0x4cb   :  { %3209 = vmatprep.subr.bf16.mxu0 %v3208_v59  ;;  %v3852_v59 = vunpack.i.l.bf16 %v5700_v53  ;;  %v3214_v39 = vpack.c.bf16 %v2175_v10, %v2174_v29  ;;  %v1875_v13 = vsel %vm93_vm1, %v3847_v40, %v3848_v52  ;;  %v2241_v10 = vld [vmem:[%s6212_s7 + $0x288] sm:$0xff] }
 0x4cc   :  { %3239 = vmatpush3.bf16.msra.mxu1 %v3238_v18  ;;  %v2222_v18 = vld [vmem:[%s6212_s7 + $0x1f0] sm:$0xff]  ;;  %v3248_v56 = vpack.c.bf16 %v2241_v10, %v2240_v34  ;;  %v5756_v37 = vmax.f32 %v1761_v17, %v1875_v13 }
 0x4cd   :  { %3241 = vmatprep.subr.bf16.mxu1 %v3240_v25  ;;  %v3857_v25 = vunpack.i.l.bf16 %v3856_v22  ;;  %v3244_v2 = vpack.c.bf16 %v2223_v61, %v2222_v18  ;;  %v5744_v18 = vmax.f32 %v1752_v4, %v1868_v54  ;;  %v3871_v61 = vpop.permute.xlu1 %3870  ;;  %v1876_v41 = vsel %vm93_vm1, %v3848_v52, %v3852_v59 }
 0x4ce   :  { %3211 = vmatpush3.bf16.msra.mxu0 %v3210_v16  ;;  %v2206_v16 = vld [vmem:[%s6212_s7 + $0x170] sm:$0xff]  ;;  %v5769_v24 = vmax.f32 %v1762_v62, %v1876_v41 }
 0x4cf   :  { %3213 = vmatprep.subr.bf16.mxu0 %v3212_v45  ;;  %v1881_v4 = vsel %vm93_vm1, %v3857_v25, %v3858_v12 }
 0x4d0   :  { %3243 = vmatpush3.bf16.msra.mxu1 %v3242_v7  ;;  %v2207_v7 = vld [vmem:[%s6212_s7 + $0x178] sm:$0xff] }
 0x4d1   :  { %v3246_v29 = vpack.c.bf16 %v2207_v7, %v2206_v16  ;;  %3245 = vmatprep.subr.bf16.mxu1 %v3244_v2 }
 0x4d2   :  { %3215 = vmatpush3.bf16.msra.mxu0 %v3214_v39 }
 0x4d3   :  { %3249 = vmatprep.subr.bf16.mxu0 %v3248_v56 }
 0x4d4   :  { %3247 = vmatpush3.bf16.msra.mxu1 %v3246_v29 }
 0x4d6   :  { %v5725_v5 = vpop.permute.xlu0 %3860 }
 0x4d7   :  { %v3863_v22 = vunpack.i.h.bf16 %v5725_v5  ;;  %v3862_v14 = vunpack.i.l.bf16 %v5725_v5  ;;  %v1874_v5 = vsel %vm93_vm1, %v3853_v20, %v3847_v40  ;;  %v3872_v40 = vunpack.i.l.bf16 %v3871_v61 }
 0x4d8   :  { %v5773_v17 = vmax.f32 %v1760_v47, %v1874_v5 }
 0x4d9   :  { %v1871_v45 = vsel %vm93_vm1, %v3842_v38, %v3862_v14  ;;  %v1872_v16 = vsel %vm93_vm1, %v3862_v14, %v3863_v22  ;;  %v3873_v38 = vunpack.i.h.bf16 %v3871_v61  ;;  %v6298_v61 = vmax.f32 %v5360_v11, 0.0 }
 0x4da   :  { %v5761_v54 = vmax.f32 %v1755_v15, %v1871_v45  ;;  %v5765_v52 = vmax.f32 %v1756_v0, %v1872_v16  ;;  %v3866_v6 = vpop.permute.xlu0 %3865  ;;  %v6295_v0 = vmax.f32 %v5338_v31, 0.0  ;;  %v2257_v31 = vld [vmem:[%s6212_s7 + $0x308] sm:$0xff]  ;;  %v3904_v34 = vpack.i.bf16 %v5773_v17, %v5769_v24 }
 0x4db   :  { %v3868_v20 = vunpack.i.h.bf16 %v3866_v6  ;;  %v3867_v39 = vunpack.i.l.bf16 %v3866_v6  ;;  %v1887_v47 = vsel %vm93_vm1, %v3872_v40, %v3873_v38  ;;  %v6300_v16 = vmax.f32 %v5370_v33, 0.0 }
 0x4dc   :  { %v3899_v23 = vpack.i.bf16 %v5761_v54, %v5744_v18  ;;  %v3909_v15 = vpack.i.bf16 %v5756_v37, %v5765_v52  ;;  %v5783_v2 = vmax.f32 %v6295_v0, %v1881_v4  ;;  %v5812_v5 = vmax.f32 %v6298_v61, %v1887_v47 }
 0x4dd   :  { %v1880_v56 = vsel %vm93_vm1, %v3868_v20, %v3857_v25  ;;  %v1882_v26 = vsel %vm93_vm1, %v3858_v12, %v3867_v39  ;;  %v2256_v12 = vld [vmem:[%s6212_s7 + $0x300] sm:$0xff]  ;;  %v6305_v61 = vmax.f32 %v5420_v60, 0.0 }
 0x4de   :  { %v5787_v62 = vmax.f32 %v6296_v9, %v1882_v26  ;;  %v3876_v51 = vpop.permute.xlu0 %3875  ;;  %3900 = vrot.lane.b32.xlu1 %v3899_v23, %s3960_s19  ;;  %3910 = vrot.lane.b32.xlu0 %v3909_v15, %s3960_s19  ;;  %v5800_v25 = vmax.f32 %v6297_v57, %v1880_v56  ;;  %v5806_v14 = vpack.c.bf16 %v2257_v31, %v2256_v12  ;;  %v6302_v12 = vmax.f32 %v5384_v35, 0.0 }
 0x4df   :  { %v3878_v41 = vunpack.i.h.bf16 %v3876_v51  ;;  %v3877_v7 = vunpack.i.l.bf16 %v3876_v51  ;;  %v6301_v51 = vmax.f32 %v5387_v28, 0.0  ;;  %v6303_v28 = vmax.f32 %v5334_v49, 0.0 }
 0x4e0   :  { %v3914_v13 = vpack.i.bf16 %v5787_v62, %v5783_v2  ;;  %3281 = vmatprep.subr.bf16.mxu1 %v5806_v14  ;;  %v3919_v11 = vpack.i.bf16 %v5812_v5, %v5800_v25  ;;  %v6306_v49 = vmax.f32 %v5429_v32, 0.0 }
 0x4e1   :  { %v1886_v29 = vsel %vm93_vm1, %v3878_v41, %v3872_v40  ;;  %v1888_v10 = vsel %vm93_vm1, %v3873_v38, %v3877_v7 }
 0x4e2   :  { %v5816_v45 = vmax.f32 %v6299_v44, %v1886_v29  ;;  %v5820_v4 = vmax.f32 %v6300_v16, %v1888_v10  ;;  %v5822_v6 = vpop.permute.xlu0 %1824  ;;  %3905 = vrot.lane.b32.xlu1 %v3904_v34, %s3960_s19  ;;  %3915 = vrot.lane.b32.xlu0 %v3914_v13, %s3960_s19  ;;  %v1953_v40 = vpop.permute.xlu1 %1952 }
 0x4e3   :  { %v1960_v33 = vsel %vm93_vm1, %v5822_v6, %v1953_v40  ;;  %v1873_v38 = vsel %vm93_vm1, %v3863_v22, %v5822_v6 }
 0x4e4   :  { %v3924_v58 = vpack.i.bf16 %v5816_v45, %v5820_v4  ;;  %v1972_v26 = vmax.f32 %v5438_v21, %v1960_v33  ;;  %v5840_v47 = vmax.f32 %v6301_v51, %v1873_v38 }
 0x4e6   :  { %v3886_v20 = vpop.permute.xlu0 %3885  ;;  %3920 = vrot.lane.b32.xlu1 %v3919_v11, %s3960_s19  ;;  %3925 = vrot.lane.b32.xlu0 %v3924_v58, %s3960_s19  ;;  %v3881_v56 = vpop.permute.xlu1 %3880 }
 0x4e7   :  { %v3888_v23 = vunpack.i.h.bf16 %v3886_v20  ;;  %v3887_v15 = vunpack.i.l.bf16 %v3886_v20  ;;  %v3883_v0 = vunpack.i.h.bf16 %v3881_v56  ;;  %v3882_v9 = vunpack.i.l.bf16 %v3881_v56 }
 0x4e8   :  { %v6307_v20 = vmax.f32 %v5434_v3, 0.0 }
 0x4e9   :  { %v1883_v41 = vsel %vm93_vm1, %v3867_v39, %v3887_v15  ;;  %v1884_v22 = vsel %vm93_vm1, %v3887_v15, %v3888_v23  ;;  %v1877_v57 = vsel %vm93_vm1, %v3852_v59, %v3882_v9  ;;  %v1878_v34 = vsel %vm93_vm1, %v3882_v9, %v3883_v0 }
 0x4ea   :  { %v5846_v31 = vmax.f32 %v6302_v12, %v1883_v41  ;;  %v1955_v13 = vpop.permute.xlu0 %1954  ;;  %2024 = vrot.lane.b32.xlu1 %v1972_v26, %s3960_s19  ;;  %v5855_v29 = vmax.f32 %v6303_v28, %v1877_v57  ;;  %v6304_v39 = vmax.f32 %v5426_v43, 0.0  ;;  %v5861_v35 = vpop.permute.xlu1 %1838  ;;  %v5869_v44 = vmax.f32 %v6305_v61, %v1884_v22 }
 0x4eb   :  { %v1879_v53 = vsel %vm93_vm1, %v3883_v0, %v5861_v35  ;;  %v1973_v32 = vmax.f32 %v6307_v20, %v1953_v40  ;;  %v1961_v15 = vsel %vm93_vm1, %v5861_v35, %v1955_v13  ;;  %v6308_v41 = vmax.f32 %v5396_v8, 0.0 }
 0x4ec   :  { %v5859_v10 = vmax.f32 %v6304_v39, %v1878_v34  ;;  %v3934_v59 = vpack.i.bf16 %v5846_v31, %v5840_v47  ;;  %v5873_v16 = vmax.f32 %v6306_v49, %v1879_v53  ;;  %v1974_v3 = vmax.f32 %v5472_v27, %v1961_v15  ;;  %v2242_v15 = vld [vmem:[%s6212_s7 + $0x290] sm:$0xff] }
 0x4ed   :  { %v6309_v12 = vmax.f32 %v5460_v46, 0.0  ;;  %v6310_v34 = vmax.f32 %v5463_v42, 0.0  ;;  %v6311_v53 = vmax.f32 %v5423_v63, 0.0  ;;  %v6312_v63 = vmax.f32 %v5453_v36, 0.0 }
 0x4ee   :  { %v3929_v43 = vpack.i.bf16 %v5859_v10, %v5855_v29  ;;  %v5877_v11 = vpop.permute.xlu0 %1852  ;;  %3935 = vrot.lane.b32.xlu0 %v3934_v59, %s3960_s19  ;;  %v3939_v58 = vpack.i.bf16 %v5873_v16, %v5869_v44  ;;  %v3891_v33 = vpop.permute.xlu1 %3890 }
 0x4ef   :  { %v3893_v60 = vunpack.i.h.bf16 %v3891_v33  ;;  %v3892_v38 = vunpack.i.l.bf16 %v3891_v33  ;;  %v1885_v40 = vsel %vm93_vm1, %v3888_v23, %v5877_v11  ;;  %v1975_v61 = vmax.f32 %v6312_v63, %v1955_v13 }
 0x4f0   :  { %3930 = vrot.lane.b32.xlu1 %v3929_v43, %s3960_s19  ;;  %v5915_v23 = vmax.f32 %v6311_v53, %v1885_v40  ;;  %v6313_v43 = vmax.f32 %v5487_v1, 0.0  ;;  %v6314_v33 = vmax.f32 %v5496_v19, 0.0  ;;  %v2224_v1 = vld [vmem:[%s6212_s7 + $0x200] sm:$0xff]  ;;  %v2225_v19 = vld [vmem:[%s6212_s7 + $0x208] sm:$0xff] }
 0x4f1   :  { %v1889_v56 = vsel %vm93_vm1, %v3877_v7, %v3892_v38  ;;  %v1890_v26 = vsel %vm93_vm1, %v3892_v38, %v3893_v60 }
 0x4f2   :  { %v5889_v0 = vpop.permute.xlu0 %1866  ;;  %3940 = vrot.lane.b32.xlu0 %v3939_v58, %s3960_s19  ;;  %v1957_v51 = vpop.permute.xlu1 %1956  ;;  %v5902_v22 = vmax.f32 %v6308_v41, %v1889_v56  ;;  %v5906_v57 = vmax.f32 %v6309_v12, %v1890_v26  ;;  %v2243_v56 = vld [vmem:[%s6212_s7 + $0x298] sm:$0xff]  ;;  %v3250_v41 = vpack.c.bf16 %v2225_v19, %v2224_v1  ;;  %v2260_v1 = vld [vmem:[%s6212_s7 + $0x320] sm:$0xff]  ;;  %v2261_v19 = vld [vmem:[%s6212_s7 + $0x328] sm:$0xff] }
 0x4f3   :  { %v1891_v9 = vsel %vm93_vm1, %v3893_v60, %v5889_v0  ;;  %v1962_v7 = vsel %vm93_vm1, %v5877_v11, %v1957_v51  ;;  %v1977_v58 = vmax.f32 %v6313_v43, %v1957_v51  ;;  %v2259_v51 = vld [vmem:[%s6212_s7 + $0x318] sm:$0xff]  ;;  %v3252_v12 = vpack.c.bf16 %v2243_v56, %v2242_v15 }
 0x4f4   :  { %2026 = vrot.lane.b32.xlu1 %v1973_v32, %s3960_s19  ;;  %v5910_v28 = vmax.f32 %v6310_v34, %v1891_v9  ;;  %v1976_v39 = vmax.f32 %v5479_v50, %v1962_v7  ;;  %v3944_v46 = vpack.i.bf16 %v5906_v57, %v5902_v22 }
 0x4f6   :  { %v1959_v59 = vpop.permute.xlu1 %1958  ;;  %2056 = vrot.lane.b32.xlu0 %v1976_v39, %s3960_s19  ;;  %v3949_v8 = vpack.i.bf16 %v5910_v28, %v5915_v23 }
 0x4f7   :  { %v1963_v42 = vsel %vm93_vm1, %v5889_v0, %v1959_v59  ;;  %v1979_v60 = vmax.f32 %v6314_v33, %v1959_v59  ;;  %v2226_v59 = vld [vmem:[%s6212_s7 + $0x210] sm:$0xff]  ;;  %v2244_v33 = vld [vmem:[%s6212_s7 + $0x2a0] sm:$0xff]  ;;  %vm3970_vm1 = vmmov 0  }
 0x4f8   :  { %2040 = vrot.lane.b32.xlu1 %v1974_v3, %s3960_s19  ;;  %v1978_v49 = vmax.f32 %v5492_v30, %v1963_v42 }
 0x4fa   :  { %3945 = vrot.lane.b32.xlu0 %v3944_v46, %s3960_s19 }
 0x4fc   :  { %3950 = vrot.lane.b32.xlu1 %v3949_v8, %s3960_s19  ;;  %v2227_v8 = vld [vmem:[%s6212_s7 + $0x218] sm:$0xff] }
 0x4fe   :  { %2042 = vrot.lane.b32.xlu0 %v1975_v61, %s3960_s19 }
 0x500   :  { %2072 = vrot.lane.b32.xlu1 %v1978_v49, %s3960_s19 }
 0x502   :  { %2058 = vrot.lane.b32.xlu0 %v1977_v58, %s3960_s19 }
 0x504   :  { %2074 = vrot.lane.b32.xlu1 %v1979_v60, %s3960_s19  ;;  %v2245_v60 = vld [vmem:[%s6212_s7 + $0x2a8] sm:$0xff] }
 0x539   :  { %v3896_v38 = vpop.permute.xlu0 %3895 }
 0x53a   :  { %v3898_v20 = vunpack.i.h.bf16 %v3896_v38  ;;  %v3897_v36 = vunpack.i.l.bf16 %v3896_v38 }
 0x53c   :  { %v2077_v13 = vsel %vm221_vm5, %v3897_v36, %v3898_v20 }
 0x53d   :  { %v2133_v32 = vmax.f32 %v5606_v55, %v2077_v13  ;;  %v2258_v55 = vld [vmem:[%s6212_s7 + $0x310] sm:$0xff] }
 0x53e   :  { %v3284_v46 = vpack.c.bf16 %v2259_v51, %v2258_v55 }
 0x53f   :  { %2350 = vmatprep.mubr.f32.mxu0 %v2133_v32  ;;  %v3256_v32 = vpack.c.bf16 %v2245_v60, %v2244_v33  ;;  %v2230_v60 = vld [vmem:[%s6212_s7 + $0x230] sm:$0xff] }
 0x550   :  { %v3901_v26 = vpop.permute.xlu1 %3900  ;;  %v5952_v9 = vpop.permute.xlu0 %3910 }
 0x551   :  { %v3903_v3 = vunpack.i.h.bf16 %v3901_v26  ;;  %v3902_v40 = vunpack.i.l.bf16 %v3901_v26  ;;  %v3912_v7 = vunpack.i.l.bf16 %v5952_v9  ;;  %v3913_v61 = vunpack.i.h.bf16 %v5952_v9 }
 0x553   :  { %v2076_v34 = vsel %vm221_vm5, %v3902_v40, %v3897_v36  ;;  %v2078_v39 = vsel %vm221_vm5, %v3898_v20, %v3903_v3  ;;  %v2079_v53 = vsel %vm221_vm5, %v3903_v3, %v3912_v7  ;;  %v3254_v36 = vpack.c.bf16 %v2227_v8, %v2226_v59  ;;  %v2228_v3 = vld [vmem:[%s6212_s7 + $0x220] sm:$0xff]  ;;  %v2229_v40 = vld [vmem:[%s6212_s7 + $0x228] sm:$0xff] }
 0x554   :  { %v2132_v42 = vmax.f32 %v5744_v18, %v2076_v34  ;;  %v2134_v63 = vmax.f32 %v5622_v48, %v2078_v39  ;;  %v5975_v49 = vpop.permute.xlu1 %3905  ;;  %v5977_v43 = vpop.permute.xlu0 %3915  ;;  %v2135_v58 = vmax.f32 %v5761_v54, %v2079_v53  ;;  %v2247_v34 = vld [vmem:[%s6212_s7 + $0x2b8] sm:$0xff]  ;;  %v3288_v39 = vpack.c.bf16 %v2261_v19, %v2260_v1  ;;  %v2265_v1 = vld [vmem:[%s6212_s7 + $0x348] sm:$0xff] }
 0x555   :  { %v3908_v18 = vunpack.i.h.bf16 %v5975_v49  ;;  %v3907_v48 = vunpack.i.l.bf16 %v5975_v49  ;;  %v3918_v38 = vunpack.i.h.bf16 %v5977_v43  ;;  %v3917_v20 = vunpack.i.l.bf16 %v5977_v43  ;;  %v2254_v43 = vld [vmem:[%s6212_s7 + $0x2f0] sm:$0xff] }
 0x556   :  { %2351 = vmatmul.mubr.f32.vlgmr.msra.gmra.mrb[24].mxu0 %v2132_v42  ;;  %2435 = vmatprep.mubr.f32.mxu1 %v2135_v58  ;;  %v3258_v59 = vpack.c.bf16 %v2229_v40, %v2228_v3  ;;  %v2262_v42 = vld [vmem:[%s6212_s7 + $0x330] sm:$0xff]  ;;  %v2251_v40 = vld [vmem:[%s6212_s7 + $0x2d8] sm:$0xff] }
 0x557   :  { %3251 = vmatpush3.bf16.msra.mxu0 %v3250_v41  ;;  %2436 = vmatmul.mubr.f32.vlgmr.msra.gmra.mrb[24].mxu1 %v2134_v63  ;;  %v2084_v54 = vsel %vm221_vm5, %v3913_v61, %v3907_v48  ;;  %v2083_v13 = vsel %vm221_vm5, %v3908_v18, %v3913_v61  ;;  %v2091_v51 = vsel %vm221_vm5, %v3917_v20, %v3918_v38  ;;  %v2263_v63 = vld [vmem:[%s6212_s7 + $0x338] sm:$0xff]  ;;  %v2250_v3 = vld [vmem:[%s6212_s7 + $0x2d0] sm:$0xff] }
 0x558   :  { %v3921_v15 = vpop.permute.xlu1 %3920  ;;  %v6000_v56 = vpop.permute.xlu0 %3925  ;;  %3253 = vmatprep.subr.bf16.mxu0 %v3252_v12  ;;  %v2140_v26 = vmax.f32 %v5756_v37, %v2084_v54  ;;  %v2139_v55 = vmax.f32 %v5773_v17, %v2083_v13  ;;  %3283 = vmatpush3.bf16.msra.mxu1 %v5806_v14  ;;  %v2246_v17 = vld [vmem:[%s6212_s7 + $0x2b0] sm:$0xff]  ;;  %v2147_v14 = vmax.f32 %v5783_v2, %v2091_v51  ;;  %v2231_v18 = vld [vmem:[%s6212_s7 + $0x238] sm:$0xff] }
 0x559   :  { %v3923_v41 = vunpack.i.h.bf16 %v3921_v15  ;;  %v3922_v12 = vunpack.i.l.bf16 %v3921_v15  ;;  %v3927_v37 = vunpack.i.l.bf16 %v6000_v56  ;;  %3285 = vmatprep.subr.bf16.mxu1 %v3284_v46  ;;  %v3928_v53 = vunpack.i.h.bf16 %v6000_v56 }
 0x55a   :  { %2355 = vmatprep.mubr.f32.mxu0 %v2140_v26  ;;  %v3260_v33 = vpack.c.bf16 %v2247_v34, %v2246_v17  ;;  %v3262_v13 = vpack.c.bf16 %v2231_v18, %v2230_v60  ;;  %v2233_v26 = vld [vmem:[%s6212_s7 + $0x248] sm:$0xff] }
 0x55b   :  { %3255 = vmatpush3.bf16.msra.mxu0 %v3254_v36  ;;  %v2090_v8 = vsel %vm221_vm5, %v3922_v12, %v3917_v20  ;;  %v2098_v2 = vsel %vm221_vm5, %v3923_v41, %v3927_v37  ;;  %v2248_v20 = vld [vmem:[%s6212_s7 + $0x2c0] sm:$0xff]  ;;  %v3292_v36 = vpack.c.bf16 %v2263_v63, %v2262_v42 }
 0x55c   :  { %2356 = vmatmul.mubr.f32.gmra.mrb[26].mxu0 %v2139_v55  ;;  %v6030_v61 = vpop.permute.xlu1 %2024  ;;  %3257 = vmatprep.subr.bf16.mxu0 %v3256_v32  ;;  %v2146_v58 = vmax.f32 %v5800_v25, %v2090_v8  ;;  %v2249_v25 = vld [vmem:[%s6212_s7 + $0x2c8] sm:$0xff]  ;;  %v2154_v54 = vmax.f32 %v5812_v5, %v2098_v2  ;;  %v2097_v32 = vsel %vm221_vm5, %v3928_v53, %v3923_v41  ;;  %v2232_v5 = vld [vmem:[%s6212_s7 + $0x240] sm:$0xff]  ;;  %v2267_v8 = vld [vmem:[%s6212_s7 + $0x358] sm:$0xff] }
 0x55d   :  { %2360 = vmatprep.mubr.f32.mxu0 %v2147_v14  ;;  %3287 = vmatpush3.bf16.msra.mxu1 %v3284_v46  ;;  %v2264_v46 = vld [vmem:[%s6212_s7 + $0x340] sm:$0xff]  ;;  %v3264_v15 = vpack.c.bf16 %v2249_v25, %v2248_v20  ;;  %v2153_v17 = vmax.f32 %v5816_v45, %v2097_v32  ;;  %v2234_v2 = vld [vmem:[%s6212_s7 + $0x250] sm:$0xff] }
 0x55e   :  { %3289 = vmatprep.subr.bf16.mxu1 %v3288_v39  ;;  %v3296_v34 = vpack.c.bf16 %v2265_v1, %v2264_v46  ;;  %v2252_v25 = vld [vmem:[%s6212_s7 + $0x2e0] sm:$0xff]  ;;  %v2237_v1 = vld [vmem:[%s6212_s7 + $0x268] sm:$0xff] }
 0x55f   :  { %3259 = vmatpush3.bf16.msra.mxu0 %v3258_v59  ;;  %v2266_v59 = vld [vmem:[%s6212_s7 + $0x350] sm:$0xff] }
 0x560   :  { %2361 = vmatmul.mubr.f32.gmra.mrb[28].mxu0 %v2146_v58  ;;  %v6056_v19 = vpop.permute.xlu0 %3935  ;;  %3261 = vmatprep.subr.bf16.mxu0 %v3260_v33  ;;  %v3268_v58 = vpack.c.bf16 %v2251_v40, %v2250_v3  ;;  %v2235_v33 = vld [vmem:[%s6212_s7 + $0x258] sm:$0xff]  ;;  %v3300_v32 = vpack.c.bf16 %v2267_v8, %v2266_v59  ;;  %v2268_v3 = vld [vmem:[%s6212_s7 + $0x360] sm:$0x7f] }
 0x561   :  { %v3937_v55 = vunpack.i.l.bf16 %v6056_v19  ;;  %2365 = vmatprep.mubr.f32.mxu0 %v2154_v54  ;;  %3291 = vmatpush3.bf16.msra.mxu1 %v3288_v39  ;;  %v3938_v53 = vunpack.i.h.bf16 %v6056_v19  ;;  %v3266_v39 = vpack.c.bf16 %v2233_v26, %v2232_v5  ;;  %v2253_v54 = vld [vmem:[%s6212_s7 + $0x2e8] sm:$0xff]  ;;  %v3270_v49 = vpack.c.bf16 %v2235_v33, %v2234_v2 }
 0x562   :  { %v6065_v51 = vpop.permute.xlu1 %3930  ;;  %3293 = vmatprep.subr.bf16.mxu1 %v3292_v36  ;;  %v3272_v46 = vpack.c.bf16 %v2253_v54, %v2252_v25 }
 0x563   :  { %v3933_v41 = vunpack.i.h.bf16 %v6065_v51  ;;  %v3932_v12 = vunpack.i.l.bf16 %v6065_v51  ;;  %3263 = vmatpush3.bf16.msra.mxu0 %v3262_v13  ;;  %v2081_v14 = vsel %vm221_vm5, %v3937_v55, %v6030_v61  ;;  %v2080_v2 = vsel %vm221_vm5, %v3912_v7, %v3937_v55 }
 0x564   :  { %2366 = vmatmul.mubr.f32.gmra.mrb[30].mxu0 %v2153_v17  ;;  %v6087_v45 = vpop.permute.xlu0 %3940  ;;  %3265 = vmatprep.subr.bf16.mxu0 %v3264_v15  ;;  %v2137_v42 = vmax.f32 %v5840_v47, %v2081_v14  ;;  %v2239_v17 = vld [vmem:[%s6212_s7 + $0x278] sm:$0xff]  ;;  %v2136_v9 = vmax.f32 %v5765_v52, %v2080_v2 }
 0x565   :  { %v2086_v63 = vsel %vm221_vm5, %v3932_v12, %v3933_v41  ;;  %v3942_v60 = vunpack.i.l.bf16 %v6087_v45  ;;  %v2085_v47 = vsel %vm221_vm5, %v3907_v48, %v3932_v12  ;;  %3295 = vmatpush3.bf16.msra.mxu1 %v3292_v36  ;;  %v2092_v48 = vsel %vm221_vm5, %v3918_v38, %v3938_v53  ;;  %v2238_v12 = vld [vmem:[%s6212_s7 + $0x270] sm:$0xff] }
 0x566   :  { %v2027_v18 = vpop.permute.xlu1 %2026  ;;  %v2142_v20 = vmax.f32 %v5855_v29, %v2086_v63  ;;  %2520 = vmatprep.mubr.f32.mxu0 %v2137_v42  ;;  %v2141_v13 = vmax.f32 %v5769_v24, %v2085_v47  ;;  %3297 = vmatprep.subr.bf16.mxu1 %v3296_v34  ;;  %v2236_v24 = vld [vmem:[%s6212_s7 + $0x260] sm:$0xff]  ;;  %v2148_v38 = vmax.f32 %v5787_v62, %v2092_v48  ;;  %v3943_v59 = vunpack.i.h.bf16 %v6087_v45 }
 0x567   :  { %3267 = vmatpush3.bf16.msra.mxu0 %v3266_v39  ;;  %v2093_v29 = vsel %vm221_vm5, %v3938_v53, %v3942_v60  ;;  %v3274_v26 = vpack.c.bf16 %v2237_v1, %v2236_v24  ;;  %v3278_v14 = vpack.c.bf16 %v2239_v17, %v2238_v12  ;;  %v2082_v8 = vsel %vm221_vm5, %v6030_v61, %v2027_v18 }
 0x568   :  { %2440 = vmatprep.mubr.f32.mxu1 %v2142_v20  ;;  %3269 = vmatprep.subr.bf16.mxu0 %v3268_v58  ;;  %v2149_v36 = vmax.f32 %v5846_v31, %v2093_v29  ;;  %v2057_v5 = vpop.permute.xlu0 %2056  ;;  %v2255_v31 = vld [vmem:[%s6212_s7 + $0x2f8] sm:$0xff]  ;;  %v1926_v58 = vmax.f32 %v5438_v21, %v5822_v6  ;;  %v1933_v6 = vmax.f32 %v5472_v27, %v5861_v35  ;;  %v3969_v45 = vmov 0.0|0.0   ;;  %v2627_v29 = vld [vmem:[%s6213_s5 + $0x8] sm:$0xff] }
 0x569   :  { %2441 = vmatmul.mubr.f32.gmra.mrb[26].mxu1 %v2141_v13  ;;  %v3276_v40 = vpack.c.bf16 %v2255_v31, %v2254_v43  ;;  %v2087_v55 = vsel %vm221_vm5, %v3933_v41, %v3943_v59 }
 0x56a   :  { %v2041_v15 = vpop.permute.xlu1 %2040  ;;  %3299 = vmatpush3.bf16.msra.mxu1 %v3296_v34  ;;  %2445 = vmatprep.mubr.f32.mxu1 %v2149_v36  ;;  %v2138_v47 = vmax.f32 %v1926_v58, %v2082_v8 }
 0x56b   :  { %3301 = vmatprep.subr.bf16.mxu1 %v3300_v32  ;;  %3271 = vmatpush3.bf16.msra.mxu0 %v3270_v49  ;;  %v2088_v56 = vsel %vm221_vm5, %v3943_v59, %v2041_v15 }
 0x56c   :  { %3273 = vmatprep.subr.bf16.mxu0 %v3272_v46  ;;  %v3946_v34 = vpop.permute.xlu0 %3945 }
 0x56d   :  { %2446 = vmatmul.mubr.f32.gmra.mrb[28].mxu1 %v2148_v38  ;;  %v3948_v53 = vunpack.i.h.bf16 %v3946_v34  ;;  %v3947_v39 = vunpack.i.l.bf16 %v3946_v34 }
 0x56e   :  { %v3951_v62 = vpop.permute.xlu1 %3950  ;;  %3303 = vmatpush3.bf16.msra.mxu1 %v3300_v32 }
 0x56f   :  { %2957 = vmatprep.subr.msk.mxu1 %vm2282_vm15, %v2268_v3  ;;  %3275 = vmatpush3.bf16.msra.mxu0 %v3274_v26  ;;  %v2100_v42 = vsel %vm221_vm5, %v3947_v39, %v3948_v53  ;;  %v2099_v63 = vsel %vm221_vm5, %v3927_v37, %v3947_v39  ;;  %v3952_v37 = vunpack.i.l.bf16 %v3951_v62 }
 0x570   :  { %3277 = vmatprep.subr.bf16.mxu0 %v3276_v40  ;;  %v2043_v20 = vpop.permute.xlu0 %2042  ;;  %v2156_v61 = vmax.f32 %v5902_v22, %v2100_v42  ;;  %v2155_v18 = vmax.f32 %v5820_v4, %v2099_v63  ;;  %v1940_v4 = vmax.f32 %v5479_v50, %v5877_v11  ;;  %v2144_v22 = vmax.f32 %v5873_v16, %v2088_v56 }
 0x571   :  { %v2089_v21 = vsel %vm221_vm5, %v2041_v15, %v2043_v20  ;;  %v2095_v27 = vsel %vm221_vm5, %v3952_v37, %v2057_v5  ;;  %v1947_v50 = vmax.f32 %v5492_v30, %v5889_v0  ;;  %v3953_v16 = vunpack.i.h.bf16 %v3951_v62 }
 0x572   :  { %v2073_v33 = vpop.permute.xlu1 %2072  ;;  %2958 = vmatpush3.msk.msra.mxu1 %vm2282_vm15, %v2268_v3  ;;  %2450 = vmatprep.mubr.f32.mxu1 %v2156_v61  ;;  %v2145_v25 = vmax.f32 %v1933_v6, %v2089_v21  ;;  %v2143_v11 = vmax.f32 %v5859_v10, %v2087_v55  ;;  %v2151_v51 = vmax.f32 %v5915_v23, %v2095_v27 }
 0x573   :  { %3279 = vmatpush3.bf16.msra.mxu0 %v3278_v14  ;;  %2451 = vmatmul.mubr.f32.gmra.mrb[30].mxu1 %v2155_v18  ;;  %v2094_v41 = vsel %vm221_vm5, %v3942_v60, %v3952_v37  ;;  %v2102_v13 = vsel %vm221_vm5, %v3953_v16, %v2073_v33  ;;  %v2101_v10 = vsel %vm221_vm5, %v3948_v53, %v3953_v16  ;;  %v2626_v60 = vld [vmem:[%s6213_s5] sm:$0xff] }
 0x574   :  { %v2059_v19 = vpop.permute.xlu0 %2058  ;;  %2959 = vmatprep.mubr.msk.f32.mxu1 %vm2269_vm0, %v2138_v47  ;;  %v2150_v30 = vmax.f32 %v5869_v44, %v2094_v41  ;;  %v2158_v0 = vmax.f32 %v5910_v28, %v2102_v13  ;;  %v2157_v23 = vmax.f32 %v5906_v57, %v2101_v10  ;;  %3304 = vmatprep.subr.bf16.mxu1 %v3969_v45  ;;  %v2628_v44 = vld [vmem:[%s6213_s5 + $0x10] sm:$0xff]  ;;  %v6315_v28 = vmov 0.0   ;;  %v2629_v57 = vld [vmem:[%s6213_s5 + $0x18] sm:$0xff] }
 0x575   :  { %v2096_v54 = vsel %vm221_vm5, %v2057_v5, %v2059_v19  ;;  %v3305_v49 = vpack.c.bf16 %v2627_v29, %v2626_v60  ;;  %v3308_v48 = vpack.c.bf16 %v2629_v57, %v2628_v44 }
 0x576   :  { %v2075_v7 = vpop.permute.xlu1 %2074  ;;  %2521 = vmatmul.mubr.f32.vlgmr.msra.gmra.mrb[32].mxu0 %v2136_v9  ;;  %v2152_v35 = vmax.f32 %v1940_v4, %v2096_v54 }
 0x577   :  { %v2103_v52 = vsel %vm221_vm5, %v2073_v33, %v2075_v7  ;;  %2525 = vmatprep.mubr.f32.mxu0 %v2144_v22  ;;  %2960 = vmatmul.mubr.msk.f32.vlgmr.msra.gmra.mrb[32].mxu1 %vm2269_vm0, %v2145_v25 }
 0x578   :  { %2962 = vmatprep.mubr.msk.f32.mxu1 %vm2269_vm0, %v2152_v35  ;;  %v2159_v32 = vmax.f32 %v1947_v50, %v2103_v52  ;;  %3306 = vmatpush3.bf16.msra.mxu1 %v3305_v49 }
 0x579   :  { %3307 = vmatprep.subr.bf16.mxu1 %v3969_v45 }
 0x57a   :  { %2526 = vmatmul.mubr.f32.gmra.mrb[34].mxu0 %v2143_v11 }
 0x57b   :  { %2530 = vmatprep.mubr.f32.mxu0 %v2151_v51  ;;  %2963 = vmatmul.mubr.msk.f32.gmra.mrb[34].mxu1 %vm2269_vm0, %v2159_v32 }
 0x57c   :  { %2973 = vmatprep.mubr.msk.f32.mxu1 %vm3970_vm1, %v6315_v28  ;;  %3309 = vmatpush3.bf16.msra.mxu1 %v3308_v48 }
 0x57e   :  { %2531 = vmatmul.mubr.f32.gmra.mrb[36].mxu0 %v2150_v30 }
 0x57f   :  { %2535 = vmatprep.mubr.f32.mxu0 %v2158_v0  ;;  %v2777_v0 = vld [vmem:[%s6214_s6] ss:$0 sm:$0xff] }
 0x582   :  { %2536 = vmatmul.mubr.f32.gmra.mrb[38].mxu0 %v2157_v23 }
 0x629   :  { %v2811_v36 = vpop.f32.mrb[24].mxu0 }
 0x62a   :  { %v2812_v46 = vpop.f32.mrb[25].mxu0  ;;  %v2855_v24 = vpop.f32.mrb[24].mxu1 }
 0x62b   :  { %v2813_v1 = vadd.f32 %v2812_v46, %v2811_v36  ;;  %v2856_v15 = vpop.f32.mrb[25].mxu1 }
 0x62c   :  { %v2857_v5 = vadd.f32 %v2856_v15, %v2855_v24 }
 0x62e   :  { %v2438_v43 = vadd.f32 %v2857_v5, %v2813_v1 }
 0x62f   :  { %v2814_v31 = vpop.f32.mrb[26].mxu0 }
 0x630   :  { %v2815_v38 = vpop.f32.mrb[27].mxu0 }
 0x631   :  { %v2816_v26 = vadd.f32 %v2815_v38, %v2814_v31 }
 0x633   :  { %v2817_v3 = vpop.f32.mrb[28].mxu0 }
 0x634   :  { %v2818_v40 = vpop.f32.mrb[29].mxu0 }
 0x635   :  { %v2819_v12 = vadd.f32 %v2818_v40, %v2817_v3 }
 0x637   :  { %v2820_v17 = vpop.f32.mrb[30].mxu0 }
 0x638   :  { %v2821_v62 = vpop.f32.mrb[31].mxu0 }
 0x639   :  { %v2822_v34 = vadd.f32 %v2821_v62, %v2820_v17 }
 0x63c   :  { %v2858_v53 = vpop.f32.mrb[26].mxu1 }
 0x63d   :  { %v2859_v39 = vpop.f32.mrb[27].mxu1 }
 0x63e   :  { %v2860_v14 = vadd.f32 %v2859_v39, %v2858_v53 }
 0x640   :  { %v2443_v59 = vadd.f32 %v2860_v14, %v2816_v26  ;;  %v2861_v8 = vpop.f32.mrb[28].mxu1 }
 0x641   :  { %v2862_v42 = vpop.f32.mrb[29].mxu1 }
 0x642   :  { %v2863_v63 = vadd.f32 %v2862_v42, %v2861_v8 }
 0x644   :  { %v2448_v58 = vadd.f32 %v2863_v63, %v2819_v12 }
 0x646   :  { %v2864_v2 = vpop.f32.mrb[30].mxu1 }
 0x647   :  { %v2865_v33 = vpop.f32.mrb[31].mxu1 }
 0x648   :  { %v2866_v20 = vadd.f32 %v2865_v33, %v2864_v2 }
 0x649   :  { %v2899_v61 = vpop.f32.mrb[32].mxu0 }
 0x64a   :  { %v2900_v18 = vpop.f32.mrb[33].mxu0  ;;  %v2453_v56 = vadd.f32 %v2866_v20, %v2822_v34  ;;  %v2961_v47 = vpop.f32.mrb[32].mxu1 }
 0x64b   :  { %v2901_v37 = vadd.f32 %v2900_v18, %v2899_v61  ;;  %v2607_v21 = vpop.f32.mrb[33].mxu1 }
 0x64d   :  { %v2902_v6 = vpop.f32.mrb[34].mxu0  ;;  %v2523_v9 = vadd.f32 %v2901_v37, %v2438_v43 }
 0x64e   :  { %v2903_v4 = vpop.f32.mrb[35].mxu0  ;;  %v2964_v19 = vpop.f32.mrb[34].mxu1 }
 0x64f   :  { %v2608_v22 = vadd.f32 %v2607_v21, %v2523_v9  ;;  %v2904_v7 = vadd.f32 %v2903_v4, %v2902_v6  ;;  %v2617_v55 = vpop.f32.mrb[35].mxu1 }
 0x651   :  { %v2528_v25 = vadd.f32 %v2904_v7, %v2443_v59  ;;  %v2905_v54 = vpop.f32.mrb[36].mxu0  ;;  %2637 = vxpose.xlu0.b32.start [1/4] (short) (narrow) %v2608_v22, 8 }
 0x652   :  { %v2906_v27 = vpop.f32.mrb[37].mxu0 }
 0x653   :  { %v2613_v52 = vadd.f32 %v2961_v47, %v2528_v25  ;;  %v2907_v35 = vadd.f32 %v2906_v27, %v2905_v54 }
 0x655   :  { %v2533_v50 = vadd.f32 %v2907_v35, %v2448_v58  ;;  %v2908_v16 = vpop.f32.mrb[38].mxu0  ;;  %2638 = vxpose.xlu0.b32.cont [2/4] (short) (narrow) %v2613_v52, 8 }
 0x656   :  { %v2909_v11 = vpop.f32.mrb[39].mxu0 }
 0x657   :  { %v2618_v51 = vadd.f32 %v2617_v55, %v2533_v50  ;;  %v2910_v41 = vadd.f32 %v2909_v11, %v2908_v16 }
 0x659   :  { %v2538_v13 = vadd.f32 %v2910_v41, %v2453_v56  ;;  %2639 = vxpose.xlu0.b32.cont [3/4] (short) (narrow) %v2618_v51, 8 }
 0x65b   :  { %v2623_v32 = vadd.f32 %v2964_v19, %v2538_v13 }
 0x65d   :  { %2640 = vxpose.xlu0.b32.end [4/4] (short) (narrow) %v2623_v32, 8 }
 0x6d1   :  { %v2653_v30 = vpop.trf.xlu0 }
 0x6d2   :  { %2974 = vmatmul.mubr.msk.f32.vlgmr.msra.gmra.mrb[36].mxu1 %vm2669_vm2, %v2653_v30 }
 0x7a5   :  { %v2739_v10 = vpop.f32.mrb[36].mxu1 }
 0x7a6   :  { %v2740_v23 = vadd.f32 %v2777_v0, %v2739_v10  ;;  %v2975_v45 = vpop.f32.mrb[37].mxu1 }
 0x7a8   :  { %2743 = vst [vmem:[%s6215_s8] sm:$0xf] %v2740_v23 }

</bundles_post_ra>
